<compile_context>
chip_gen: v7x
topology: tpu7x:2x2x1
jax: 0.10.0
libtpu: 0.0.40
codegen_flags: <defaults>
</compile_context>

<pallas_src>
import jax
import jax.numpy as jnp
from jax.experimental import pallas as pl
from jax.experimental.pallas import tpu as pltpu


def _round_up(n, m):
    return ((n + m - 1) // m) * m


def _pad_gate_cols(w, H, Hp):
    """Pad the last axis of w == (..., 4*H) so each of the 4 gate blocks
    [i, f, g, o] is widened from H to Hp columns (zero fill)."""
    if Hp == H:
        return w
    lead = w.shape[:-1]
    w = w.reshape(lead + (4, H))
    w = jnp.pad(w, [(0, 0)] * (len(lead) + 1) + [(0, Hp - H)])
    return w.reshape(lead + (4 * Hp,))


def _lstm_block_kernel(x_ref, wih_ref, whh_ref, b_ref, out_ref,
                       gx_scr, h_scr, c_scr):
    # x_ref:   (T*Bp, D)      time-block of inputs, flattened (t, b) rows
    # wih_ref: (D, 4*Hp)      resident input->gate weights
    # whh_ref: (Hp, 4*Hp)     resident hidden->gate weights
    # b_ref:   (1, 4*Hp)      fused (b_ih + b_hh), gate-padded
    # out_ref: (T*Bp, Hp)     time-block of outputs (lane-dense)
    # gx_scr:  (T*Bp, 4*Hp)   precomputed input-projection gates for the block
    # h_scr/c_scr: (Bp, Hp)   recurrent state carried across grid steps
    Bp, Hp = h_scr.shape
    T = out_ref.shape[0] // Bp

    # Zero-initialize carried state at the first time block (== init_hidden).
    @pl.when(pl.program_id(0) == 0)
    def _():
        h_scr[...] = jnp.zeros_like(h_scr)
        c_scr[...] = jnp.zeros_like(c_scr)

    # Hoisted input projection + bias for the whole T-step block:
    # one (T*Bp, D) @ (D, 4*Hp) MXU matmul instead of T tiny per-step dots.
    gx_scr[...] = (
        jnp.dot(x_ref[...], wih_ref[...], preferred_element_type=jnp.float32)
        + b_ref[...]
    )

    def step(t, carry):
        h, c = carry
        row = pl.multiple_of(t * Bp, 8)
        # Single per-step MXU dot: h_prev @ W_hh, added to precomputed x-gates.
        g = gx_scr[pl.ds(row, Bp), :] + jnp.dot(
            h, whh_ref[...], preferred_element_type=jnp.float32)
        # PyTorch gate order [i, f, g, o]; Hp is a multiple of 128 so these
        # slices are lane-aligned static views (no cross-lane relayout).
        i_g = jax.nn.sigmoid(g[:, 0 * Hp:1 * Hp])
        f_g = jax.nn.sigmoid(g[:, 1 * Hp:2 * Hp])
        g_g = jnp.tanh(g[:, 2 * Hp:3 * Hp])
        o_g = jax.nn.sigmoid(g[:, 3 * Hp:4 * Hp])
        c_new = f_g * c + i_g * g_g
        h_new = o_g * jnp.tanh(c_new)
        out_ref[pl.ds(row, Bp), :] = h_new.astype(out_ref.dtype)
        return h_new, c_new

    # Recurrent state lives in vregs for the whole block; scratch is only
    # touched at the block boundary.
    h_fin, c_fin = jax.lax.fori_loop(
        0, T, step, (h_scr[...], c_scr[...]), unroll=True)
    h_scr[...] = h_fin
    c_scr[...] = c_fin


def lstm_forward(x, w_ih, w_hh, b_ih, b_hh, *, t_block=8):
    """Single-layer LSTM forward with zero initial (h, c).

    x:    (S, B, D)  float32   (seq-first, like nn.LSTM with batch_first=False)
    w_ih: (4H, D), w_hh: (4H, H), b_ih/b_hh: (4H,)   (PyTorch parameter shapes)
    returns: (S, B, H) output sequence (h_t for every t).
    """
    S, B, D = x.shape
    H = w_hh.shape[1]

    Hp = _round_up(H, 128)        # lane-pad hidden dim (per gate)
    Bp = _round_up(B, 8)          # sublane-pad batch
    Sp = _round_up(S, t_block)    # pad sequence to a whole number of blocks

    # ---- Parameter prep (glue, cold path) -------------------------------
    # Transpose to (in, 4H), pad each gate block to Hp columns, pad W_hh rows
    # to Hp.  Padded rows/cols are zero, so padded h/c lanes stay exactly 0.
    wih_p = _pad_gate_cols(jnp.asarray(w_ih, jnp.float32).T, H, Hp)   # (D, 4Hp)
    whh_p = _pad_gate_cols(jnp.asarray(w_hh, jnp.float32).T, H, Hp)   # (H, 4Hp)
    whh_p = jnp.pad(whh_p, ((0, Hp - H), (0, 0)))                     # (Hp, 4Hp)
    bias = (jnp.asarray(b_ih, jnp.float32)
            + jnp.asarray(b_hh, jnp.float32)).reshape(1, 4 * H)
    bias_p = _pad_gate_cols(bias, H, Hp)                              # (1, 4Hp)

    # Pad inputs (zeros in padded time steps / batch rows are discarded) and
    # flatten (t, b) into lane-friendly 2-D row blocks.
    x_p = jnp.pad(jnp.asarray(x, jnp.float32),
                  ((0, Sp - S), (0, Bp - B), (0, 0)))
    x2d = x_p.reshape(Sp * Bp, D)

    grid = (Sp // t_block,)
    rows_per_block = t_block * Bp

    out2d = pl.pallas_call(
        _lstm_block_kernel,
        out_shape=jax.ShapeDtypeStruct((Sp * Bp, Hp), jnp.float32),
        grid_spec=pltpu.PrefetchScalarGridSpec(
            num_scalar_prefetch=0,
            grid=grid,
            in_specs=[
                pl.BlockSpec((rows_per_block, D), lambda tb: (tb, 0)),
                pl.BlockSpec((D, 4 * Hp), lambda tb: (0, 0)),
                pl.BlockSpec((Hp, 4 * Hp), lambda tb: (0, 0)),
                pl.BlockSpec((1, 4 * Hp), lambda tb: (0, 0)),
            ],
            out_specs=pl.BlockSpec((rows_per_block, Hp), lambda tb: (tb, 0)),
            scratch_shapes=[
                pltpu.VMEM((rows_per_block, 4 * Hp), jnp.float32),  # gx block
                pltpu.VMEM((Bp, Hp), jnp.float32),                  # h carry
                pltpu.VMEM((Bp, Hp), jnp.float32),                  # c carry
            ],
        ),
        compiler_params=pltpu.CompilerParams(
            dimension_semantics=("arbitrary",),   # sequential recurrence
        ),
    )(x2d, wih_p, whh_p, bias_p)

    # Strip padding: (Sp*Bp, Hp) -> (S, B, H)
    out = out2d.reshape(Sp, Bp, Hp)[:S, :B, :H]
    return out


def lstm_reference(x, w_ih, w_hh, b_ih, b_hh):
    """Pure-JAX reference matching torch.nn.LSTM (1 layer, zero init state)."""
    S, B, D = x.shape
    H = w_hh.shape[1]
    bias = b_ih + b_hh

    def step(carry, x_t):
        h, c = carry
        gates = x_t @ w_ih.T + h @ w_hh.T + bias
        i = jax.nn.sigmoid(gates[:, 0 * H:1 * H])
        f = jax.nn.sigmoid(gates[:, 1 * H:2 * H])
        g = jnp.tanh(gates[:, 2 * H:3 * H])
        o = jax.nn.sigmoid(gates[:, 3 * H:4 * H])
        c_new = f * c + i * g
        h_new = o * jnp.tanh(c_new)
        return (h_new, c_new), h_new

    h0 = jnp.zeros((B, H), jnp.float32)
    c0 = jnp.zeros((B, H), jnp.float32)
    _, ys = jax.lax.scan(step, (h0, c0), x)
    return ys


if __name__ == "__main__":
    # Module config: lstm_dim = (in_dim, hidden_dim), num_layer = 1
    IN_DIM, HIDDEN = 16, 32
    SEQ, BATCH = 8, 4

    key = jax.random.PRNGKey(0)
    kx, k1, k2, k3, k4 = jax.random.split(key, 5)

    # Deterministic parameter init, matching PyTorch's U(-1/sqrt(H), 1/sqrt(H)).
    bound = 1.0 / (HIDDEN ** 0.5)
    w_ih = jax.random.uniform(k1, (4 * HIDDEN, IN_DIM), jnp.float32, -bound, bound)
    w_hh = jax.random.uniform(k2, (4 * HIDDEN, HIDDEN), jnp.float32, -bound, bound)
    b_ih = jax.random.uniform(k3, (4 * HIDDEN,), jnp.float32, -bound, bound)
    b_hh = jax.random.uniform(k4, (4 * HIDDEN,), jnp.float32, -bound, bound)

    x = jax.random.normal(kx, (SEQ, BATCH, IN_DIM), jnp.float32)

    out = lstm_forward(x, w_ih, w_hh, b_ih, b_hh)
    out = jax.block_until_ready(out)

    ref = lstm_reference(x, w_ih, w_hh, b_ih, b_hh)
    assert out.shape == (SEQ, BATCH, HIDDEN)
    assert jnp.allclose(out, ref, atol=1e-5, rtol=1e-5), "mismatch vs reference"

    print("KERNEL_OK")
</pallas_src>

<mosaic_0001>
module attributes {stable_mosaic.version = 11 : i64} {
  func.func @_lstm_block_kernel(%arg0: i32, %arg1: memref<64x16xf32, #tpu.memory_space<vmem>>, %arg2: memref<16x512xf32, #tpu.memory_space<vmem>>, %arg3: memref<128x512xf32, #tpu.memory_space<vmem>>, %arg4: memref<1x512xf32, #tpu.memory_space<vmem>>, %arg5: memref<64x128xf32, #tpu.memory_space<vmem>>, %arg6: memref<64x512xf32, #tpu.memory_space<vmem>>, %arg7: memref<8x128xf32, #tpu.memory_space<vmem>>, %arg8: memref<8x128xf32, #tpu.memory_space<vmem>>) attributes {dimension_semantics = [#tpu.dimension_semantics<arbitrary>], iteration_bounds = array<i64: 1>, scalar_prefetch = 0 : i64, scratch_operands = 3 : i64, tpu.core_type = #tpu.core_type<tc>, window_params = [{transform_indices = @transform_0, window_bounds = array<i64: 64, 16>}, {pipeline_mode = #tpu.pipeline_mode<synchronous>, transform_indices = @transform_1, window_bounds = array<i64: 16, 512>}, {pipeline_mode = #tpu.pipeline_mode<synchronous>, transform_indices = @transform_2, window_bounds = array<i64: 128, 512>}, {pipeline_mode = #tpu.pipeline_mode<synchronous>, transform_indices = @transform_3, window_bounds = array<i64: 1, 512>}, {transform_indices = @transform_4, window_bounds = array<i64: 64, 128>}]} {
    %c0_i32 = arith.constant 0 : i32
    %0 = arith.cmpi eq, %arg0, %c0_i32 : i32
    %1 = arith.extui %0 : i1 to i32
    %c0_i32_0 = arith.constant 0 : i32
    %2 = arith.cmpi ne, %1, %c0_i32_0 : i32
    scf.if %2 {
      %cst_89 = arith.constant 0.000000e+00 : f32
      %286 = vector.broadcast %cst_89 : f32 to vector<8x128xf32>
      %c0_90 = arith.constant 0 : index
      %c0_91 = arith.constant 0 : index
      %287 = vector.load %arg7[%c0_90, %c0_91] : memref<8x128xf32, #tpu.memory_space<vmem>>, vector<8x128xf32>
      tpu.vector_store %arg7[%c0_90, %c0_91], %286 {strides = array<i32>} : memref<8x128xf32, #tpu.memory_space<vmem>>, vector<8x128xf32>,
      %cst_92 = arith.constant 0.000000e+00 : f32
      %288 = vector.broadcast %cst_92 : f32 to vector<8x128xf32>
      %c0_93 = arith.constant 0 : index
      %c0_94 = arith.constant 0 : index
      %289 = vector.load %arg8[%c0_93, %c0_94] : memref<8x128xf32, #tpu.memory_space<vmem>>, vector<8x128xf32>
      tpu.vector_store %arg8[%c0_93, %c0_94], %288 {strides = array<i32>} : memref<8x128xf32, #tpu.memory_space<vmem>>, vector<8x128xf32>,
    } else {
    }
    %c0 = arith.constant 0 : index
    %c0_1 = arith.constant 0 : index
    %3 = vector.load %arg1[%c0, %c0_1] : memref<64x16xf32, #tpu.memory_space<vmem>>, vector<64x16xf32>
    %c0_2 = arith.constant 0 : index
    %c0_3 = arith.constant 0 : index
    %4 = vector.load %arg2[%c0_2, %c0_3] : memref<16x512xf32, #tpu.memory_space<vmem>>, vector<16x512xf32>
    %cst = arith.constant dense<0.000000e+00> : vector<64x512xf32>
    %5 = tpu.matmul %3, %4, %cst {dimension_numbers = #tpu.dot_dimension_numbers<[1], [0], [0], [1], [0, 0, 1, 1], [], []>} : vector<64x16xf32>, vector<16x512xf32>, vector<64x512xf32> -> vector<64x512xf32>
    %c0_4 = arith.constant 0 : index
    %c0_5 = arith.constant 0 : index
    %6 = vector.load %arg4[%c0_4, %c0_5] : memref<1x512xf32, #tpu.memory_space<vmem>>, vector<1x512xf32>
    %7 = vector.broadcast %6 : vector<1x512xf32> to vector<64x512xf32>
    %8 = arith.addf %5, %7 : vector<64x512xf32>
    %c0_6 = arith.constant 0 : index
    %c0_7 = arith.constant 0 : index
    %9 = vector.load %arg6[%c0_6, %c0_7] : memref<64x512xf32, #tpu.memory_space<vmem>>, vector<64x512xf32>
    tpu.vector_store %arg6[%c0_6, %c0_7], %8 {strides = array<i32>} : memref<64x512xf32, #tpu.memory_space<vmem>>, vector<64x512xf32>,
    %c0_8 = arith.constant 0 : index
    %c0_9 = arith.constant 0 : index
    %10 = vector.load %arg7[%c0_8, %c0_9] : memref<8x128xf32, #tpu.memory_space<vmem>>, vector<8x128xf32>
    %c0_10 = arith.constant 0 : index
    %c0_11 = arith.constant 0 : index
    %11 = vector.load %arg8[%c0_10, %c0_11] : memref<8x128xf32, #tpu.memory_space<vmem>>, vector<8x128xf32>
    %c0_i32_12 = arith.constant 0 : i32
    %c8_i32 = arith.constant 8 : i32
    %12 = arith.muli %c0_i32_12, %c8_i32 : i32
    %13 = tpu.assume_multiple %12, 8 : i32
    %14 = arith.index_cast %13 : i32 to index
    %c0_13 = arith.constant 0 : index
    %15 = vector.load %arg6[%14, %c0_13] : memref<64x512xf32, #tpu.memory_space<vmem>>, vector<8x512xf32>
    %c0_14 = arith.constant 0 : index
    %c0_15 = arith.constant 0 : index
    %16 = vector.load %arg3[%c0_14, %c0_15] : memref<128x512xf32, #tpu.memory_space<vmem>>, vector<128x512xf32>
    %cst_16 = arith.constant dense<0.000000e+00> : vector<8x512xf32>
    %17 = tpu.matmul %10, %16, %cst_16 {dimension_numbers = #tpu.dot_dimension_numbers<[1], [0], [0], [1], [0, 0, 1, 1], [], []>} : vector<8x128xf32>, vector<128x512xf32>, vector<8x512xf32> -> vector<8x512xf32>
    %18 = arith.addf %15, %17 : vector<8x512xf32>
    %19 = vector.extract_strided_slice %18 {offsets = [0, 0], sizes = [8, 128], strides = [1, 1]} : vector<8x512xf32> to vector<8x128xf32>
    %20 = arith.negf %19 : vector<8x128xf32>
    %21 = math.exp %20 : vector<8x128xf32>
    %cst_17 = arith.constant 1.000000e+00 : f32
    %22 = vector.broadcast %cst_17 : f32 to vector<8x128xf32>
    %23 = arith.addf %22, %21 : vector<8x128xf32>
    %24 = arith.divf %22, %23 : vector<8x128xf32>
    %25 = vector.extract_strided_slice %18 {offsets = [0, 128], sizes = [8, 128], strides = [1, 1]} : vector<8x512xf32> to vector<8x128xf32>
    %26 = arith.negf %25 : vector<8x128xf32>
    %27 = math.exp %26 : vector<8x128xf32>
    %cst_18 = arith.constant 1.000000e+00 : f32
    %28 = vector.broadcast %cst_18 : f32 to vector<8x128xf32>
    %29 = arith.addf %28, %27 : vector<8x128xf32>
    %30 = arith.divf %28, %29 : vector<8x128xf32>
    %31 = vector.extract_strided_slice %18 {offsets = [0, 256], sizes = [8, 128], strides = [1, 1]} : vector<8x512xf32> to vector<8x128xf32>
    %32 = math.tanh %31 : vector<8x128xf32>
    %33 = vector.extract_strided_slice %18 {offsets = [0, 384], sizes = [8, 128], strides = [1, 1]} : vector<8x512xf32> to vector<8x128xf32>
    %34 = arith.negf %33 : vector<8x128xf32>
    %35 = math.exp %34 : vector<8x128xf32>
    %cst_19 = arith.constant 1.000000e+00 : f32
    %36 = vector.broadcast %cst_19 : f32 to vector<8x128xf32>
    %37 = arith.addf %36, %35 : vector<8x128xf32>
    %38 = arith.divf %36, %37 : vector<8x128xf32>
    %39 = arith.mulf %30, %11 : vector<8x128xf32>
    %40 = arith.mulf %24, %32 : vector<8x128xf32>
    %41 = arith.addf %39, %40 : vector<8x128xf32>
    %42 = math.tanh %41 : vector<8x128xf32>
    %43 = arith.mulf %38, %42 : vector<8x128xf32>
    %44 = arith.index_cast %13 : i32 to index
    %c0_20 = arith.constant 0 : index
    %45 = vector.load %arg5[%44, %c0_20] : memref<64x128xf32, #tpu.memory_space<vmem>>, vector<8x128xf32>
    tpu.vector_store %arg5[%44, %c0_20], %43 {strides = array<i32>} : memref<64x128xf32, #tpu.memory_space<vmem>>, vector<8x128xf32>,
    %c1_i32 = arith.constant 1 : i32
    %c8_i32_21 = arith.constant 8 : i32
    %46 = arith.muli %c1_i32, %c8_i32_21 : i32
    %47 = tpu.assume_multiple %46, 8 : i32
    %48 = arith.index_cast %47 : i32 to index
    %c0_22 = arith.constant 0 : index
    %49 = vector.load %arg6[%48, %c0_22] : memref<64x512xf32, #tpu.memory_space<vmem>>, vector<8x512xf32>
    %c0_23 = arith.constant 0 : index
    %c0_24 = arith.constant 0 : index
    %50 = vector.load %arg3[%c0_23, %c0_24] : memref<128x512xf32, #tpu.memory_space<vmem>>, vector<128x512xf32>
    %cst_25 = arith.constant dense<0.000000e+00> : vector<8x512xf32>
    %51 = tpu.matmul %43, %50, %cst_25 {dimension_numbers = #tpu.dot_dimension_numbers<[1], [0], [0], [1], [0, 0, 1, 1], [], []>} : vector<8x128xf32>, vector<128x512xf32>, vector<8x512xf32> -> vector<8x512xf32>
    %52 = arith.addf %49, %51 : vector<8x512xf32>
    %53 = vector.extract_strided_slice %52 {offsets = [0, 0], sizes = [8, 128], strides = [1, 1]} : vector<8x512xf32> to vector<8x128xf32>
    %54 = arith.negf %53 : vector<8x128xf32>
    %55 = math.exp %54 : vector<8x128xf32>
    %cst_26 = arith.constant 1.000000e+00 : f32
    %56 = vector.broadcast %cst_26 : f32 to vector<8x128xf32>
    %57 = arith.addf %56, %55 : vector<8x128xf32>
    %58 = arith.divf %56, %57 : vector<8x128xf32>
    %59 = vector.extract_strided_slice %52 {offsets = [0, 128], sizes = [8, 128], strides = [1, 1]} : vector<8x512xf32> to vector<8x128xf32>
    %60 = arith.negf %59 : vector<8x128xf32>
    %61 = math.exp %60 : vector<8x128xf32>
    %cst_27 = arith.constant 1.000000e+00 : f32
    %62 = vector.broadcast %cst_27 : f32 to vector<8x128xf32>
    %63 = arith.addf %62, %61 : vector<8x128xf32>
    %64 = arith.divf %62, %63 : vector<8x128xf32>
    %65 = vector.extract_strided_slice %52 {offsets = [0, 256], sizes = [8, 128], strides = [1, 1]} : vector<8x512xf32> to vector<8x128xf32>
    %66 = math.tanh %65 : vector<8x128xf32>
    %67 = vector.extract_strided_slice %52 {offsets = [0, 384], sizes = [8, 128], strides = [1, 1]} : vector<8x512xf32> to vector<8x128xf32>
    %68 = arith.negf %67 : vector<8x128xf32>
    %69 = math.exp %68 : vector<8x128xf32>
    %cst_28 = arith.constant 1.000000e+00 : f32
    %70 = vector.broadcast %cst_28 : f32 to vector<8x128xf32>
    %71 = arith.addf %70, %69 : vector<8x128xf32>
    %72 = arith.divf %70, %71 : vector<8x128xf32>
    %73 = arith.mulf %64, %41 : vector<8x128xf32>
    %74 = arith.mulf %58, %66 : vector<8x128xf32>
    %75 = arith.addf %73, %74 : vector<8x128xf32>
    %76 = math.tanh %75 : vector<8x128xf32>
    %77 = arith.mulf %72, %76 : vector<8x128xf32>
    %78 = arith.index_cast %47 : i32 to index
    %c0_29 = arith.constant 0 : index
    %79 = vector.load %arg5[%78, %c0_29] : memref<64x128xf32, #tpu.memory_space<vmem>>, vector<8x128xf32>
    tpu.vector_store %arg5[%78, %c0_29], %77 {strides = array<i32>} : memref<64x128xf32, #tpu.memory_space<vmem>>, vector<8x128xf32>,
    %c2_i32 = arith.constant 2 : i32
    %c8_i32_30 = arith.constant 8 : i32
    %80 = arith.muli %c2_i32, %c8_i32_30 : i32
    %81 = tpu.assume_multiple %80, 8 : i32
    %82 = arith.index_cast %81 : i32 to index
    %c0_31 = arith.constant 0 : index
    %83 = vector.load %arg6[%82, %c0_31] : memref<64x512xf32, #tpu.memory_space<vmem>>, vector<8x512xf32>
    %c0_32 = arith.constant 0 : index
    %c0_33 = arith.constant 0 : index
    %84 = vector.load %arg3[%c0_32, %c0_33] : memref<128x512xf32, #tpu.memory_space<vmem>>, vector<128x512xf32>
    %cst_34 = arith.constant dense<0.000000e+00> : vector<8x512xf32>
    %85 = tpu.matmul %77, %84, %cst_34 {dimension_numbers = #tpu.dot_dimension_numbers<[1], [0], [0], [1], [0, 0, 1, 1], [], []>} : vector<8x128xf32>, vector<128x512xf32>, vector<8x512xf32> -> vector<8x512xf32>
    %86 = arith.addf %83, %85 : vector<8x512xf32>
    %87 = vector.extract_strided_slice %86 {offsets = [0, 0], sizes = [8, 128], strides = [1, 1]} : vector<8x512xf32> to vector<8x128xf32>
    %88 = arith.negf %87 : vector<8x128xf32>
    %89 = math.exp %88 : vector<8x128xf32>
    %cst_35 = arith.constant 1.000000e+00 : f32
    %90 = vector.broadcast %cst_35 : f32 to vector<8x128xf32>
    %91 = arith.addf %90, %89 : vector<8x128xf32>
    %92 = arith.divf %90, %91 : vector<8x128xf32>
    %93 = vector.extract_strided_slice %86 {offsets = [0, 128], sizes = [8, 128], strides = [1, 1]} : vector<8x512xf32> to vector<8x128xf32>
    %94 = arith.negf %93 : vector<8x128xf32>
    %95 = math.exp %94 : vector<8x128xf32>
    %cst_36 = arith.constant 1.000000e+00 : f32
    %96 = vector.broadcast %cst_36 : f32 to vector<8x128xf32>
    %97 = arith.addf %96, %95 : vector<8x128xf32>
    %98 = arith.divf %96, %97 : vector<8x128xf32>
    %99 = vector.extract_strided_slice %86 {offsets = [0, 256], sizes = [8, 128], strides = [1, 1]} : vector<8x512xf32> to vector<8x128xf32>
    %100 = math.tanh %99 : vector<8x128xf32>
    %101 = vector.extract_strided_slice %86 {offsets = [0, 384], sizes = [8, 128], strides = [1, 1]} : vector<8x512xf32> to vector<8x128xf32>
    %102 = arith.negf %101 : vector<8x128xf32>
    %103 = math.exp %102 : vector<8x128xf32>
    %cst_37 = arith.constant 1.000000e+00 : f32
    %104 = vector.broadcast %cst_37 : f32 to vector<8x128xf32>
    %105 = arith.addf %104, %103 : vector<8x128xf32>
    %106 = arith.divf %104, %105 : vector<8x128xf32>
    %107 = arith.mulf %98, %75 : vector<8x128xf32>
    %108 = arith.mulf %92, %100 : vector<8x128xf32>
    %109 = arith.addf %107, %108 : vector<8x128xf32>
    %110 = math.tanh %109 : vector<8x128xf32>
    %111 = arith.mulf %106, %110 : vector<8x128xf32>
    %112 = arith.index_cast %81 : i32 to index
    %c0_38 = arith.constant 0 : index
    %113 = vector.load %arg5[%112, %c0_38] : memref<64x128xf32, #tpu.memory_space<vmem>>, vector<8x128xf32>
    tpu.vector_store %arg5[%112, %c0_38], %111 {strides = array<i32>} : memref<64x128xf32, #tpu.memory_space<vmem>>, vector<8x128xf32>,
    %c3_i32 = arith.constant 3 : i32
    %c8_i32_39 = arith.constant 8 : i32
    %114 = arith.muli %c3_i32, %c8_i32_39 : i32
    %115 = tpu.assume_multiple %114, 8 : i32
    %116 = arith.index_cast %115 : i32 to index
    %c0_40 = arith.constant 0 : index
    %117 = vector.load %arg6[%116, %c0_40] : memref<64x512xf32, #tpu.memory_space<vmem>>, vector<8x512xf32>
    %c0_41 = arith.constant 0 : index
    %c0_42 = arith.constant 0 : index
    %118 = vector.load %arg3[%c0_41, %c0_42] : memref<128x512xf32, #tpu.memory_space<vmem>>, vector<128x512xf32>
    %cst_43 = arith.constant dense<0.000000e+00> : vector<8x512xf32>
    %119 = tpu.matmul %111, %118, %cst_43 {dimension_numbers = #tpu.dot_dimension_numbers<[1], [0], [0], [1], [0, 0, 1, 1], [], []>} : vector<8x128xf32>, vector<128x512xf32>, vector<8x512xf32> -> vector<8x512xf32>
    %120 = arith.addf %117, %119 : vector<8x512xf32>
    %121 = vector.extract_strided_slice %120 {offsets = [0, 0], sizes = [8, 128], strides = [1, 1]} : vector<8x512xf32> to vector<8x128xf32>
    %122 = arith.negf %121 : vector<8x128xf32>
    %123 = math.exp %122 : vector<8x128xf32>
    %cst_44 = arith.constant 1.000000e+00 : f32
    %124 = vector.broadcast %cst_44 : f32 to vector<8x128xf32>
    %125 = arith.addf %124, %123 : vector<8x128xf32>
    %126 = arith.divf %124, %125 : vector<8x128xf32>
    %127 = vector.extract_strided_slice %120 {offsets = [0, 128], sizes = [8, 128], strides = [1, 1]} : vector<8x512xf32> to vector<8x128xf32>
    %128 = arith.negf %127 : vector<8x128xf32>
    %129 = math.exp %128 : vector<8x128xf32>
    %cst_45 = arith.constant 1.000000e+00 : f32
    %130 = vector.broadcast %cst_45 : f32 to vector<8x128xf32>
    %131 = arith.addf %130, %129 : vector<8x128xf32>
    %132 = arith.divf %130, %131 : vector<8x128xf32>
    %133 = vector.extract_strided_slice %120 {offsets = [0, 256], sizes = [8, 128], strides = [1, 1]} : vector<8x512xf32> to vector<8x128xf32>
    %134 = math.tanh %133 : vector<8x128xf32>
    %135 = vector.extract_strided_slice %120 {offsets = [0, 384], sizes = [8, 128], strides = [1, 1]} : vector<8x512xf32> to vector<8x128xf32>
    %136 = arith.negf %135 : vector<8x128xf32>
    %137 = math.exp %136 : vector<8x128xf32>
    %cst_46 = arith.constant 1.000000e+00 : f32
    %138 = vector.broadcast %cst_46 : f32 to vector<8x128xf32>
    %139 = arith.addf %138, %137 : vector<8x128xf32>
    %140 = arith.divf %138, %139 : vector<8x128xf32>
    %141 = arith.mulf %132, %109 : vector<8x128xf32>
    %142 = arith.mulf %126, %134 : vector<8x128xf32>
    %143 = arith.addf %141, %142 : vector<8x128xf32>
    %144 = math.tanh %143 : vector<8x128xf32>
    %145 = arith.mulf %140, %144 : vector<8x128xf32>
    %146 = arith.index_cast %115 : i32 to index
    %c0_47 = arith.constant 0 : index
    %147 = vector.load %arg5[%146, %c0_47] : memref<64x128xf32, #tpu.memory_space<vmem>>, vector<8x128xf32>
    tpu.vector_store %arg5[%146, %c0_47], %145 {strides = array<i32>} : memref<64x128xf32, #tpu.memory_space<vmem>>, vector<8x128xf32>,
    %c4_i32 = arith.constant 4 : i32
    %c8_i32_48 = arith.constant 8 : i32
    %148 = arith.muli %c4_i32, %c8_i32_48 : i32
    %149 = tpu.assume_multiple %148, 8 : i32
    %150 = arith.index_cast %149 : i32 to index
    %c0_49 = arith.constant 0 : index
    %151 = vector.load %arg6[%150, %c0_49] : memref<64x512xf32, #tpu.memory_space<vmem>>, vector<8x512xf32>
    %c0_50 = arith.constant 0 : index
    %c0_51 = arith.constant 0 : index
    %152 = vector.load %arg3[%c0_50, %c0_51] : memref<128x512xf32, #tpu.memory_space<vmem>>, vector<128x512xf32>
    %cst_52 = arith.constant dense<0.000000e+00> : vector<8x512xf32>
    %153 = tpu.matmul %145, %152, %cst_52 {dimension_numbers = #tpu.dot_dimension_numbers<[1], [0], [0], [1], [0, 0, 1, 1], [], []>} : vector<8x128xf32>, vector<128x512xf32>, vector<8x512xf32> -> vector<8x512xf32>
    %154 = arith.addf %151, %153 : vector<8x512xf32>
    %155 = vector.extract_strided_slice %154 {offsets = [0, 0], sizes = [8, 128], strides = [1, 1]} : vector<8x512xf32> to vector<8x128xf32>
    %156 = arith.negf %155 : vector<8x128xf32>
    %157 = math.exp %156 : vector<8x128xf32>
    %cst_53 = arith.constant 1.000000e+00 : f32
    %158 = vector.broadcast %cst_53 : f32 to vector<8x128xf32>
    %159 = arith.addf %158, %157 : vector<8x128xf32>
    %160 = arith.divf %158, %159 : vector<8x128xf32>
    %161 = vector.extract_strided_slice %154 {offsets = [0, 128], sizes = [8, 128], strides = [1, 1]} : vector<8x512xf32> to vector<8x128xf32>
    %162 = arith.negf %161 : vector<8x128xf32>
    %163 = math.exp %162 : vector<8x128xf32>
    %cst_54 = arith.constant 1.000000e+00 : f32
    %164 = vector.broadcast %cst_54 : f32 to vector<8x128xf32>
    %165 = arith.addf %164, %163 : vector<8x128xf32>
    %166 = arith.divf %164, %165 : vector<8x128xf32>
    %167 = vector.extract_strided_slice %154 {offsets = [0, 256], sizes = [8, 128], strides = [1, 1]} : vector<8x512xf32> to vector<8x128xf32>
    %168 = math.tanh %167 : vector<8x128xf32>
    %169 = vector.extract_strided_slice %154 {offsets = [0, 384], sizes = [8, 128], strides = [1, 1]} : vector<8x512xf32> to vector<8x128xf32>
    %170 = arith.negf %169 : vector<8x128xf32>
    %171 = math.exp %170 : vector<8x128xf32>
    %cst_55 = arith.constant 1.000000e+00 : f32
    %172 = vector.broadcast %cst_55 : f32 to vector<8x128xf32>
    %173 = arith.addf %172, %171 : vector<8x128xf32>
    %174 = arith.divf %172, %173 : vector<8x128xf32>
    %175 = arith.mulf %166, %143 : vector<8x128xf32>
    %176 = arith.mulf %160, %168 : vector<8x128xf32>
    %177 = arith.addf %175, %176 : vector<8x128xf32>
    %178 = math.tanh %177 : vector<8x128xf32>
    %179 = arith.mulf %174, %178 : vector<8x128xf32>
    %180 = arith.index_cast %149 : i32 to index
    %c0_56 = arith.constant 0 : index
    %181 = vector.load %arg5[%180, %c0_56] : memref<64x128xf32, #tpu.memory_space<vmem>>, vector<8x128xf32>
    tpu.vector_store %arg5[%180, %c0_56], %179 {strides = array<i32>} : memref<64x128xf32, #tpu.memory_space<vmem>>, vector<8x128xf32>,
    %c5_i32 = arith.constant 5 : i32
    %c8_i32_57 = arith.constant 8 : i32
    %182 = arith.muli %c5_i32, %c8_i32_57 : i32
    %183 = tpu.assume_multiple %182, 8 : i32
    %184 = arith.index_cast %183 : i32 to index
    %c0_58 = arith.constant 0 : index
    %185 = vector.load %arg6[%184, %c0_58] : memref<64x512xf32, #tpu.memory_space<vmem>>, vector<8x512xf32>
    %c0_59 = arith.constant 0 : index
    %c0_60 = arith.constant 0 : index
    %186 = vector.load %arg3[%c0_59, %c0_60] : memref<128x512xf32, #tpu.memory_space<vmem>>, vector<128x512xf32>
    %cst_61 = arith.constant dense<0.000000e+00> : vector<8x512xf32>
    %187 = tpu.matmul %179, %186, %cst_61 {dimension_numbers = #tpu.dot_dimension_numbers<[1], [0], [0], [1], [0, 0, 1, 1], [], []>} : vector<8x128xf32>, vector<128x512xf32>, vector<8x512xf32> -> vector<8x512xf32>
    %188 = arith.addf %185, %187 : vector<8x512xf32>
    %189 = vector.extract_strided_slice %188 {offsets = [0, 0], sizes = [8, 128], strides = [1, 1]} : vector<8x512xf32> to vector<8x128xf32>
    %190 = arith.negf %189 : vector<8x128xf32>
    %191 = math.exp %190 : vector<8x128xf32>
    %cst_62 = arith.constant 1.000000e+00 : f32
    %192 = vector.broadcast %cst_62 : f32 to vector<8x128xf32>
    %193 = arith.addf %192, %191 : vector<8x128xf32>
    %194 = arith.divf %192, %193 : vector<8x128xf32>
    %195 = vector.extract_strided_slice %188 {offsets = [0, 128], sizes = [8, 128], strides = [1, 1]} : vector<8x512xf32> to vector<8x128xf32>
    %196 = arith.negf %195 : vector<8x128xf32>
    %197 = math.exp %196 : vector<8x128xf32>
    %cst_63 = arith.constant 1.000000e+00 : f32
    %198 = vector.broadcast %cst_63 : f32 to vector<8x128xf32>
    %199 = arith.addf %198, %197 : vector<8x128xf32>
    %200 = arith.divf %198, %199 : vector<8x128xf32>
    %201 = vector.extract_strided_slice %188 {offsets = [0, 256], sizes = [8, 128], strides = [1, 1]} : vector<8x512xf32> to vector<8x128xf32>
    %202 = math.tanh %201 : vector<8x128xf32>
    %203 = vector.extract_strided_slice %188 {offsets = [0, 384], sizes = [8, 128], strides = [1, 1]} : vector<8x512xf32> to vector<8x128xf32>
    %204 = arith.negf %203 : vector<8x128xf32>
    %205 = math.exp %204 : vector<8x128xf32>
    %cst_64 = arith.constant 1.000000e+00 : f32
    %206 = vector.broadcast %cst_64 : f32 to vector<8x128xf32>
    %207 = arith.addf %206, %205 : vector<8x128xf32>
    %208 = arith.divf %206, %207 : vector<8x128xf32>
    %209 = arith.mulf %200, %177 : vector<8x128xf32>
    %210 = arith.mulf %194, %202 : vector<8x128xf32>
    %211 = arith.addf %209, %210 : vector<8x128xf32>
    %212 = math.tanh %211 : vector<8x128xf32>
    %213 = arith.mulf %208, %212 : vector<8x128xf32>
    %214 = arith.index_cast %183 : i32 to index
    %c0_65 = arith.constant 0 : index
    %215 = vector.load %arg5[%214, %c0_65] : memref<64x128xf32, #tpu.memory_space<vmem>>, vector<8x128xf32>
    tpu.vector_store %arg5[%214, %c0_65], %213 {strides = array<i32>} : memref<64x128xf32, #tpu.memory_space<vmem>>, vector<8x128xf32>,
    %c6_i32 = arith.constant 6 : i32
    %c8_i32_66 = arith.constant 8 : i32
    %216 = arith.muli %c6_i32, %c8_i32_66 : i32
    %217 = tpu.assume_multiple %216, 8 : i32
    %218 = arith.index_cast %217 : i32 to index
    %c0_67 = arith.constant 0 : index
    %219 = vector.load %arg6[%218, %c0_67] : memref<64x512xf32, #tpu.memory_space<vmem>>, vector<8x512xf32>
    %c0_68 = arith.constant 0 : index
    %c0_69 = arith.constant 0 : index
    %220 = vector.load %arg3[%c0_68, %c0_69] : memref<128x512xf32, #tpu.memory_space<vmem>>, vector<128x512xf32>
    %cst_70 = arith.constant dense<0.000000e+00> : vector<8x512xf32>
    %221 = tpu.matmul %213, %220, %cst_70 {dimension_numbers = #tpu.dot_dimension_numbers<[1], [0], [0], [1], [0, 0, 1, 1], [], []>} : vector<8x128xf32>, vector<128x512xf32>, vector<8x512xf32> -> vector<8x512xf32>
    %222 = arith.addf %219, %221 : vector<8x512xf32>
    %223 = vector.extract_strided_slice %222 {offsets = [0, 0], sizes = [8, 128], strides = [1, 1]} : vector<8x512xf32> to vector<8x128xf32>
    %224 = arith.negf %223 : vector<8x128xf32>
    %225 = math.exp %224 : vector<8x128xf32>
    %cst_71 = arith.constant 1.000000e+00 : f32
    %226 = vector.broadcast %cst_71 : f32 to vector<8x128xf32>
    %227 = arith.addf %226, %225 : vector<8x128xf32>
    %228 = arith.divf %226, %227 : vector<8x128xf32>
    %229 = vector.extract_strided_slice %222 {offsets = [0, 128], sizes = [8, 128], strides = [1, 1]} : vector<8x512xf32> to vector<8x128xf32>
    %230 = arith.negf %229 : vector<8x128xf32>
    %231 = math.exp %230 : vector<8x128xf32>
    %cst_72 = arith.constant 1.000000e+00 : f32
    %232 = vector.broadcast %cst_72 : f32 to vector<8x128xf32>
    %233 = arith.addf %232, %231 : vector<8x128xf32>
    %234 = arith.divf %232, %233 : vector<8x128xf32>
    %235 = vector.extract_strided_slice %222 {offsets = [0, 256], sizes = [8, 128], strides = [1, 1]} : vector<8x512xf32> to vector<8x128xf32>
    %236 = math.tanh %235 : vector<8x128xf32>
    %237 = vector.extract_strided_slice %222 {offsets = [0, 384], sizes = [8, 128], strides = [1, 1]} : vector<8x512xf32> to vector<8x128xf32>
    %238 = arith.negf %237 : vector<8x128xf32>
    %239 = math.exp %238 : vector<8x128xf32>
    %cst_73 = arith.constant 1.000000e+00 : f32
    %240 = vector.broadcast %cst_73 : f32 to vector<8x128xf32>
    %241 = arith.addf %240, %239 : vector<8x128xf32>
    %242 = arith.divf %240, %241 : vector<8x128xf32>
    %243 = arith.mulf %234, %211 : vector<8x128xf32>
    %244 = arith.mulf %228, %236 : vector<8x128xf32>
    %245 = arith.addf %243, %244 : vector<8x128xf32>
    %246 = math.tanh %245 : vector<8x128xf32>
    %247 = arith.mulf %242, %246 : vector<8x128xf32>
    %248 = arith.index_cast %217 : i32 to index
    %c0_74 = arith.constant 0 : index
    %249 = vector.load %arg5[%248, %c0_74] : memref<64x128xf32, #tpu.memory_space<vmem>>, vector<8x128xf32>
    tpu.vector_store %arg5[%248, %c0_74], %247 {strides = array<i32>} : memref<64x128xf32, #tpu.memory_space<vmem>>, vector<8x128xf32>,
    %c7_i32 = arith.constant 7 : i32
    %c8_i32_75 = arith.constant 8 : i32
    %250 = arith.muli %c7_i32, %c8_i32_75 : i32
    %251 = tpu.assume_multiple %250, 8 : i32
    %252 = arith.index_cast %251 : i32 to index
    %c0_76 = arith.constant 0 : index
    %253 = vector.load %arg6[%252, %c0_76] : memref<64x512xf32, #tpu.memory_space<vmem>>, vector<8x512xf32>
    %c0_77 = arith.constant 0 : index
    %c0_78 = arith.constant 0 : index
    %254 = vector.load %arg3[%c0_77, %c0_78] : memref<128x512xf32, #tpu.memory_space<vmem>>, vector<128x512xf32>
    %cst_79 = arith.constant dense<0.000000e+00> : vector<8x512xf32>
    %255 = tpu.matmul %247, %254, %cst_79 {dimension_numbers = #tpu.dot_dimension_numbers<[1], [0], [0], [1], [0, 0, 1, 1], [], []>} : vector<8x128xf32>, vector<128x512xf32>, vector<8x512xf32> -> vector<8x512xf32>
    %256 = arith.addf %253, %255 : vector<8x512xf32>
    %257 = vector.extract_strided_slice %256 {offsets = [0, 0], sizes = [8, 128], strides = [1, 1]} : vector<8x512xf32> to vector<8x128xf32>
    %258 = arith.negf %257 : vector<8x128xf32>
    %259 = math.exp %258 : vector<8x128xf32>
    %cst_80 = arith.constant 1.000000e+00 : f32
    %260 = vector.broadcast %cst_80 : f32 to vector<8x128xf32>
    %261 = arith.addf %260, %259 : vector<8x128xf32>
    %262 = arith.divf %260, %261 : vector<8x128xf32>
    %263 = vector.extract_strided_slice %256 {offsets = [0, 128], sizes = [8, 128], strides = [1, 1]} : vector<8x512xf32> to vector<8x128xf32>
    %264 = arith.negf %263 : vector<8x128xf32>
    %265 = math.exp %264 : vector<8x128xf32>
    %cst_81 = arith.constant 1.000000e+00 : f32
    %266 = vector.broadcast %cst_81 : f32 to vector<8x128xf32>
    %267 = arith.addf %266, %265 : vector<8x128xf32>
    %268 = arith.divf %266, %267 : vector<8x128xf32>
    %269 = vector.extract_strided_slice %256 {offsets = [0, 256], sizes = [8, 128], strides = [1, 1]} : vector<8x512xf32> to vector<8x128xf32>
    %270 = math.tanh %269 : vector<8x128xf32>
    %271 = vector.extract_strided_slice %256 {offsets = [0, 384], sizes = [8, 128], strides = [1, 1]} : vector<8x512xf32> to vector<8x128xf32>
    %272 = arith.negf %271 : vector<8x128xf32>
    %273 = math.exp %272 : vector<8x128xf32>
    %cst_82 = arith.constant 1.000000e+00 : f32
    %274 = vector.broadcast %cst_82 : f32 to vector<8x128xf32>
    %275 = arith.addf %274, %273 : vector<8x128xf32>
    %276 = arith.divf %274, %275 : vector<8x128xf32>
    %277 = arith.mulf %268, %245 : vector<8x128xf32>
    %278 = arith.mulf %262, %270 : vector<8x128xf32>
    %279 = arith.addf %277, %278 : vector<8x128xf32>
    %280 = math.tanh %279 : vector<8x128xf32>
    %281 = arith.mulf %276, %280 : vector<8x128xf32>
    %282 = arith.index_cast %251 : i32 to index
    %c0_83 = arith.constant 0 : index
    %283 = vector.load %arg5[%282, %c0_83] : memref<64x128xf32, #tpu.memory_space<vmem>>, vector<8x128xf32>
    tpu.vector_store %arg5[%282, %c0_83], %281 {strides = array<i32>} : memref<64x128xf32, #tpu.memory_space<vmem>>, vector<8x128xf32>,
    %c8_i32_84 = arith.constant 8 : i32
    %c0_85 = arith.constant 0 : index
    %c0_86 = arith.constant 0 : index
    %284 = vector.load %arg7[%c0_85, %c0_86] : memref<8x128xf32, #tpu.memory_space<vmem>>, vector<8x128xf32>
    tpu.vector_store %arg7[%c0_85, %c0_86], %281 {strides = array<i32>} : memref<8x128xf32, #tpu.memory_space<vmem>>, vector<8x128xf32>,
    %c0_87 = arith.constant 0 : index
    %c0_88 = arith.constant 0 : index
    %285 = vector.load %arg8[%c0_87, %c0_88] : memref<8x128xf32, #tpu.memory_space<vmem>>, vector<8x128xf32>
    tpu.vector_store %arg8[%c0_87, %c0_88], %279 {strides = array<i32>} : memref<8x128xf32, #tpu.memory_space<vmem>>, vector<8x128xf32>,
    return
  }
  func.func @transform_0(%arg0: i32) -> (i32, i32) {
    %c0_i32 = arith.constant 0 : i32
    %c0_i32_0 = arith.constant 0 : i32
    return %arg0, %c0_i32 : i32, i32
  }
  func.func @transform_1(%arg0: i32) -> (i32, i32) {
    %c0_i32 = arith.constant 0 : i32
    %c0_i32_0 = arith.constant 0 : i32
    %c0_i32_1 = arith.constant 0 : i32
    return %c0_i32, %c0_i32_0 : i32, i32
  }
  func.func @transform_2(%arg0: i32) -> (i32, i32) {
    %c0_i32 = arith.constant 0 : i32
    %c0_i32_0 = arith.constant 0 : i32
    %c0_i32_1 = arith.constant 0 : i32
    return %c0_i32, %c0_i32_0 : i32, i32
  }
  func.func @transform_3(%arg0: i32) -> (i32, i32) {
    %c0_i32 = arith.constant 0 : i32
    %c0_i32_0 = arith.constant 0 : i32
    %c0_i32_1 = arith.constant 0 : i32
    return %c0_i32, %c0_i32_0 : i32, i32
  }
  func.func @transform_4(%arg0: i32) -> (i32, i32) {
    %c0_i32 = arith.constant 0 : i32
    %c0_i32_0 = arith.constant 0 : i32
    return %arg0, %c0_i32 : i32, i32
  }
}

</mosaic_0001>

<bundles_post_ra>
// kernel: tpu_custom_call.1
= control target key start
LH: loop header
LB: loop body
LE: loop exit
PB: predicated region body
PF: predicated region fallthrough
CT: control target
= control target key end

     0   :  { %9 = vsyncpa [#allocation6], 0  ;;  %s3734_s0 = inlined_call_operand.vmem [shape: f32[64,16], index: 0, kind: input, shape index: {}]   ;;  %s3735_s1 = inlined_call_operand.vmem [shape: f32[16,512], index: 1, kind: input, shape index: {}]   ;;  %s3736_s2 = inlined_call_operand.hbm [shape: f32[128,512], index: 2, kind: input, shape index: {}]   ;;  %s3737_s3 = inlined_call_operand.vmem [shape: f32[1,512], index: 3, kind: input, shape index: {}]   ;;  %s3738_s4 = inlined_call_operand.hbm [shape: f32[64,128], index: 4, kind: output, shape index: {}]  }
   0x1   :  { %10 = vsyncpa [#allocation7], 0  ;;  %s3137_s15 = smov [#allocation5]   ;;  %s3089_s19 = scalar_lea.hbm %s3736_s2, 8192 }
   0x2   :  { %s20_s16 = sshll.u32 %s3137_s15, 4  ;;  %p3090_p0 = scmp.ne.s32.totalorder %s3736_s2, %s3089_s19  ;;  %s21_s16 = int_to_ptr.vmem [resolvable:$true] %s20_s16 }
   0x3   :  { %p3093_p1 = scmp.lt.u32.totalorder %s3089_s19, %s3736_s2 }
   0x5   :  { %p3095_p2 = pnand %p3093_p1, %p3090_p0 }
   0x7   :  { %3098 = shalt.err (!%p3095_p2)
}
   0x8   :  { %s3099_s24 = scalar_lea.vmem %s21_s16, 8192  ;;  %p3104_p4 = scmp.lt.s32.totalorder %s21_s16, %s21_s16 }
   0x9   :  { %p3100_p3 = scmp.ne.s32.totalorder %s21_s16, %s3099_s24  ;;  %p3105_p5 = scmp.lt.s32.totalorder %s3099_s24, %s3099_s24 }
   0xb   :  { %p3106_p6 = por %p3105_p5, %p3104_p4 }
   0xd   :  { %p3107_p7 = pnand %p3106_p6, %p3100_p3 }
   0xf   :  { %3110 = shalt.err (!%p3107_p7)
}
  0x10   :  { %s3138_s25 = smov 512   ;;  %s3139_s26 = smov 32  }
  0x11   :  { %26 = dma.hbm_to_vmem [thread:$0]  %s3736_s2, 8192, %s21_s16, [#allocation6], %s3138_s25, %s3138_s25, %s3139_s26  }
  0x12   :  { %3133 = dma.done.wait [#allocation6], 8192  }
  0x13   :  { %3134 = vsyncadd [#allocation6], 4294959104  ;;  %v3140_v0 = vmov 0.0   ;;  %v47_v1 = vld [vmem:[%s3735_s1 + $0x8] sm:$0xff]  ;;  %v49_v3 = vld [vmem:[%s3735_s1 + $0x18] sm:$0xff]  ;;  %vm76_vm0 = vcmask 130048  }
  0x14   :  { %165 = vmatprep.mubr.f32.mxu0 %v3140_v0  ;;  %278 = vmatprep.mubr.f32.mxu1 %v3140_v0  ;;  %v51_v2 = vld [vmem:[%s3735_s1 + $0x28] sm:$0xff]  ;;  %v53_v5 = vld [vmem:[%s3735_s1 + $0x38] sm:$0xff]  ;;  %v46_v6 = vld [vmem:[%s3735_s1] sm:$0xff] }
  0x15   :  { %v2370_v4 = vpack.c.bf16 %v51_v2, %v47_v1  ;;  %v50_v7 = vld [vmem:[%s3735_s1 + $0x20] sm:$0xff]  ;;  %v2374_v8 = vpack.c.bf16 %v53_v5, %v49_v3  ;;  %v48_v10 = vld [vmem:[%s3735_s1 + $0x10] sm:$0xff]  ;;  %v369_v14 = vld [vmem:[#allocation5 + $0x8] sm:$0xff] }
  0x16   :  { %v2372_v9 = vpack.c.bf16 %v50_v7, %v46_v6  ;;  %v52_v11 = vld [vmem:[%s3735_s1 + $0x30] sm:$0xff]  ;;  %v38_v12 = vld [vmem:[%s3734_s0] sm:$0xff]  ;;  %v373_v15 = vld [vmem:[#allocation5 + $0x28] sm:$0xff] }
  0x17   :  { %2371 = vmatprep.subr.bf16.mxu0 %v2370_v4  ;;  %v2376_v13 = vpack.c.bf16 %v52_v11, %v48_v10  ;;  %v371_v16 = vld [vmem:[#allocation5 + $0x18] sm:$0xff]  ;;  %2375 = vmatprep.subr.bf16.mxu1 %v2374_v8  ;;  %v3210_v17 = vpack.c.bf16 %v373_v15, %v369_v14  ;;  %v368_v19 = vld [vmem:[#allocation5] sm:$0xff]  ;;  %v370_v23 = vld [vmem:[#allocation5 + $0x10] sm:$0xff] }
  0x18   :  { %2373 = vmatpush1.bf16.msra.mxu0 %v2372_v9  ;;  %v375_v18 = vld [vmem:[#allocation5 + $0x38] sm:$0xff]  ;;  %v372_v20 = vld [vmem:[#allocation5 + $0x20] sm:$0xff]  ;;  %v374_v24 = vld [vmem:[#allocation5 + $0x30] sm:$0xff] }
  0x19   :  { %2377 = vmatpush1.bf16.msra.mxu1 %v2376_v13  ;;  %v3212_v21 = vpack.c.bf16 %v375_v18, %v371_v16  ;;  %v3214_v22 = vpack.c.bf16 %v372_v20, %v368_v19  ;;  %2379 = vmatprep.subr.bf16.mxu0 %v3210_v17  ;;  %v3217_v25 = vpack.c.bf16 %v374_v24, %v370_v23  ;;  %v377_v26 = vld [vmem:[#allocation5 + $0x48] sm:$0xff]  ;;  %v379_v28 = vld [vmem:[#allocation5 + $0x58] sm:$0xff]  ;;  %v376_v31 = vld [vmem:[#allocation5 + $0x40] sm:$0xff] }
  0x1a   :  { %v381_v27 = vld [vmem:[#allocation5 + $0x68] sm:$0xff]  ;;  %v383_v30 = vld [vmem:[#allocation5 + $0x78] sm:$0xff]  ;;  %v380_v32 = vld [vmem:[#allocation5 + $0x60] sm:$0xff] }
  0x1b   :  { %2330 = vmatmul.mubr.msk.f32.vlgmr.msra.gmra.mrb[0].mxu0 %vm76_vm0, %v38_v12  ;;  %2411 = vmatprep.subr.bf16.mxu1 %v3212_v21  ;;  %v3221_v29 = vpack.c.bf16 %v381_v27, %v377_v26  ;;  %v39_v33 = vld [vmem:[%s3734_s0 + $0x8] sm:$0xff]  ;;  %v3228_v34 = vpack.c.bf16 %v383_v30, %v379_v28  ;;  %v3230_v35 = vpack.c.bf16 %v380_v32, %v376_v31  ;;  %v378_v36 = vld [vmem:[#allocation5 + $0x50] sm:$0xff]  ;;  %v387_v41 = vld [vmem:[#allocation5 + $0x98] sm:$0xff] }
  0x1c   :  { %2338 = vmatmul.mubr.msk.f32.vlgmr.msra.gmra.mrb[0].mxu1 %vm76_vm0, %v38_v12  ;;  %2381 = vmatpush1.bf16.msra.mxu0 %v3214_v22  ;;  %v382_v37 = vld [vmem:[#allocation5 + $0x70] sm:$0xff]  ;;  %v385_v39 = vld [vmem:[#allocation5 + $0x88] sm:$0xff]  ;;  %v391_v43 = vld [vmem:[#allocation5 + $0xb8] sm:$0xff] }
  0x1d   :  { %2413 = vmatpush1.bf16.msra.mxu1 %v3217_v25  ;;  %171 = vmatprep.mubr.f32.mxu0 %v3140_v0  ;;  %v3234_v38 = vpack.c.bf16 %v382_v37, %v378_v36  ;;  %v389_v40 = vld [vmem:[#allocation5 + $0xa8] sm:$0xff]  ;;  %v384_v44 = vld [vmem:[#allocation5 + $0x80] sm:$0xff]  ;;  %v40_v46 = vld [vmem:[%s3734_s0 + $0x10] sm:$0xff]  ;;  %v3245_v47 = vpack.c.bf16 %v391_v43, %v387_v41 }
  0x1e   :  { %284 = vmatprep.mubr.f32.mxu1 %v3140_v0  ;;  %2383 = vmatprep.subr.bf16.mxu0 %v3221_v29  ;;  %v3238_v42 = vpack.c.bf16 %v389_v40, %v385_v39  ;;  %v388_v45 = vld [vmem:[#allocation5 + $0xa0] sm:$0xff]  ;;  %v386_v48 = vld [vmem:[#allocation5 + $0x90] sm:$0xff]  ;;  %v393_v51 = vld [vmem:[#allocation5 + $0xc8] sm:$0xff] }
  0x1f   :  { %2331 = vmatmul.mubr.msk.f32.gmra.mrb[2].mxu0 %vm76_vm0, %v39_v33  ;;  %2415 = vmatprep.subr.bf16.mxu1 %v3228_v34  ;;  %v390_v49 = vld [vmem:[#allocation5 + $0xb0] sm:$0xff]  ;;  %v3249_v50 = vpack.c.bf16 %v388_v45, %v384_v44  ;;  %v397_v52 = vld [vmem:[#allocation5 + $0xe8] sm:$0xff]  ;;  %v395_v53 = vld [vmem:[#allocation5 + $0xd8] sm:$0xff] }
  0x20   :  { %2339 = vmatmul.mubr.msk.f32.gmra.mrb[2].mxu1 %vm76_vm0, %v39_v33  ;;  %2385 = vmatpush1.bf16.msra.mxu0 %v3230_v35  ;;  %v3253_v54 = vpack.c.bf16 %v390_v49, %v386_v48  ;;  %v399_v55 = vld [vmem:[#allocation5 + $0xf8] sm:$0xff]  ;;  %v392_v56 = vld [vmem:[#allocation5 + $0xc0] sm:$0xff]  ;;  %v3257_v58 = vpack.c.bf16 %v397_v52, %v393_v51  ;;  %v394_v59 = vld [vmem:[#allocation5 + $0xd0] sm:$0xff] }
  0x21   :  { %2417 = vmatpush1.bf16.msra.mxu1 %v3234_v38  ;;  %177 = vmatprep.mubr.f32.mxu0 %v3140_v0  ;;  %v396_v57 = vld [vmem:[#allocation5 + $0xe0] sm:$0xff]  ;;  %v398_v60 = vld [vmem:[#allocation5 + $0xf0] sm:$0xff]  ;;  %v3261_v61 = vpack.c.bf16 %v399_v55, %v395_v53  ;;  %v401_v62 = vld [vmem:[#allocation5 + $0x108] sm:$0xff] }
  0x22   :  { %290 = vmatprep.mubr.f32.mxu1 %v3140_v0  ;;  %2387 = vmatprep.subr.bf16.mxu0 %v3238_v42  ;;  %v405_v63 = vld [vmem:[#allocation5 + $0x128] sm:$0xff]  ;;  %v41_v1 = vld [vmem:[%s3734_s0 + $0x18] sm:$0xff]  ;;  %v3268_v2 = vpack.c.bf16 %v396_v57, %v392_v56  ;;  %v3272_v5 = vpack.c.bf16 %v398_v60, %v394_v59  ;;  %v400_v6 = vld [vmem:[#allocation5 + $0x100] sm:$0xff] }
  0x23   :  { %2332 = vmatmul.mubr.msk.f32.gmra.mrb[4].mxu0 %vm76_vm0, %v40_v46  ;;  %2419 = vmatprep.subr.bf16.mxu1 %v3245_v47  ;;  %v403_v3 = vld [vmem:[#allocation5 + $0x118] sm:$0xff]  ;;  %v404_v7 = vld [vmem:[#allocation5 + $0x120] sm:$0xff]  ;;  %v3276_v8 = vpack.c.bf16 %v405_v63, %v401_v62  ;;  %v402_v9 = vld [vmem:[#allocation5 + $0x110] sm:$0xff] }
  0x24   :  { %2340 = vmatmul.mubr.msk.f32.gmra.mrb[4].mxu1 %vm76_vm0, %v40_v46  ;;  %2389 = vmatpush1.bf16.msra.mxu0 %v3249_v50  ;;  %v407_v4 = vld [vmem:[#allocation5 + $0x138] sm:$0xff]  ;;  %v406_v10 = vld [vmem:[#allocation5 + $0x130] sm:$0xff]  ;;  %v409_v12 = vld [vmem:[#allocation5 + $0x148] sm:$0xff]  ;;  %v3287_v15 = vpack.c.bf16 %v404_v7, %v400_v6  ;;  %v56_v7 = vlaneseq }
  0x25   :  { %2421 = vmatpush1.bf16.msra.mxu1 %v3253_v54  ;;  %183 = vmatprep.mubr.f32.mxu0 %v3140_v0  ;;  %v3280_v11 = vpack.c.bf16 %v407_v4, %v403_v3  ;;  %v413_v13 = vld [vmem:[#allocation5 + $0x168] sm:$0xff]  ;;  %v42_v14 = vld [vmem:[%s3734_s0 + $0x20] sm:$0xff]  ;;  %v411_v16 = vld [vmem:[#allocation5 + $0x158] sm:$0xff]  ;;  %v3291_v19 = vpack.c.bf16 %v406_v10, %v402_v9 }
  0x26   :  { %296 = vmatprep.mubr.f32.mxu1 %v3140_v0  ;;  %2391 = vmatprep.subr.bf16.mxu0 %v3257_v58  ;;  %v415_v18 = vld [vmem:[#allocation5 + $0x178] sm:$0xff]  ;;  %v408_v20 = vld [vmem:[#allocation5 + $0x140] sm:$0xff]  ;;  %v3295_v24 = vpack.c.bf16 %v413_v13, %v409_v12  ;;  %v410_v26 = vld [vmem:[#allocation5 + $0x150] sm:$0xff]  ;;  %v57_v9 = vshrl.u32 %v56_v7, 7 }
  0x27   :  { %2333 = vmatmul.mubr.msk.f32.gmra.mrb[6].mxu0 %vm76_vm0, %v41_v1  ;;  %2423 = vmatprep.subr.bf16.mxu1 %v3261_v61  ;;  %v412_v23 = vld [vmem:[#allocation5 + $0x160] sm:$0xff]  ;;  %v414_v27 = vld [vmem:[#allocation5 + $0x170] sm:$0xff]  ;;  %v3299_v28 = vpack.c.bf16 %v415_v18, %v411_v16  ;;  %v417_v30 = vld [vmem:[#allocation5 + $0x188] sm:$0xff] }
  0x28   :  { %2341 = vmatmul.mubr.msk.f32.gmra.mrb[6].mxu1 %vm76_vm0, %v41_v1  ;;  %2393 = vmatpush1.bf16.msra.mxu0 %v3268_v2  ;;  %v421_v31 = vld [vmem:[#allocation5 + $0x1a8] sm:$0xff]  ;;  %v3306_v33 = vpack.c.bf16 %v412_v23, %v408_v20  ;;  %v419_v36 = vld [vmem:[#allocation5 + $0x198] sm:$0xff]  ;;  %v3310_v39 = vpack.c.bf16 %v414_v27, %v410_v26  ;;  %v416_v40 = vld [vmem:[#allocation5 + $0x180] sm:$0xff]  ;;  %v58_v10 = vsub.s32 0, %v57_v9  ;;  %v62_v13 = vsub.s32 1, %v57_v9 }
  0x29   :  { %2425 = vmatpush1.bf16.msra.mxu1 %v3272_v5  ;;  %189 = vmatprep.mubr.f32.mxu0 %v3140_v0  ;;  %v43_v32 = vld [vmem:[%s3734_s0 + $0x28] sm:$0xff]  ;;  %v423_v37 = vld [vmem:[#allocation5 + $0x1b8] sm:$0xff]  ;;  %v420_v41 = vld [vmem:[#allocation5 + $0x1a0] sm:$0xff]  ;;  %v3314_v43 = vpack.c.bf16 %v421_v31, %v417_v30  ;;  %v70_v20 = vsub.s32 3, %v57_v9 }
  0x2a   :  { %302 = vmatprep.mubr.f32.mxu1 %v3140_v0  ;;  %2395 = vmatprep.subr.bf16.mxu0 %v3276_v8  ;;  %v418_v44 = vld [vmem:[#allocation5 + $0x190] sm:$0xff]  ;;  %v3318_v46 = vpack.c.bf16 %v423_v37, %v419_v36  ;;  %v425_v48 = vld [vmem:[#allocation5 + $0x1c8] sm:$0xff]  ;;  %v3325_v52 = vpack.c.bf16 %v420_v41, %v416_v40  ;;  %v427_v53 = vld [vmem:[#allocation5 + $0x1d8] sm:$0xff]  ;;  %v66_v36 = vsub.s32 2, %v57_v9 }
  0x2b   :  { %2334 = vmatmul.mubr.msk.f32.gmra.mrb[8].mxu0 %vm76_vm0, %v42_v14  ;;  %2427 = vmatprep.subr.bf16.mxu1 %v3280_v11  ;;  %v422_v45 = vld [vmem:[#allocation5 + $0x1b0] sm:$0xff]  ;;  %v429_v49 = vld [vmem:[#allocation5 + $0x1e8] sm:$0xff]  ;;  %v431_v55 = vld [vmem:[#allocation5 + $0x1f8] sm:$0xff] }
  0x2c   :  { %2342 = vmatmul.mubr.msk.f32.gmra.mrb[8].mxu1 %vm76_vm0, %v42_v14  ;;  %2397 = vmatpush1.bf16.msra.mxu0 %v3287_v15  ;;  %v44_v51 = vld [vmem:[%s3734_s0 + $0x30] sm:$0xff]  ;;  %v3329_v56 = vpack.c.bf16 %v422_v45, %v418_v44  ;;  %v424_v57 = vld [vmem:[#allocation5 + $0x1c0] sm:$0xff]  ;;  %v3333_v60 = vpack.c.bf16 %v429_v49, %v425_v48  ;;  %v3337_v1 = vpack.c.bf16 %v431_v55, %v427_v53  ;;  %v45_v3 = vld [vmem:[%s3734_s0 + $0x38] sm:$0xff] }
  0x2d   :  { %2429 = vmatpush1.bf16.msra.mxu1 %v3291_v19  ;;  %195 = vmatprep.mubr.f32.mxu0 %v3140_v0  ;;  %v428_v59 = vld [vmem:[#allocation5 + $0x1e0] sm:$0xff]  ;;  %v426_v62 = vld [vmem:[#allocation5 + $0x1d0] sm:$0xff] }
  0x2e   :  { %308 = vmatprep.mubr.f32.mxu1 %v3140_v0  ;;  %2399 = vmatprep.subr.bf16.mxu0 %v3295_v24  ;;  %v430_v63 = vld [vmem:[#allocation5 + $0x1f0] sm:$0xff]  ;;  %v3344_v4 = vpack.c.bf16 %v428_v59, %v424_v57  ;;  %v54_v12 = vld [vmem:[%s3737_s3] sm:$0xf]  ;;  %s3141_s3 = smov [#allocation8]  }
  0x2f   :  { %2335 = vmatmul.mubr.msk.f32.gmra.mrb[10].mxu0 %vm76_vm0, %v43_v32  ;;  %2431 = vmatprep.subr.bf16.mxu1 %v3299_v28  ;;  %v3348_v6 = vpack.c.bf16 %v430_v63, %v426_v62  ;;  %v3400_v14 = vrot.slane %v54_v12, %v58_v10  ;;  %v3402_v16 = vrot.slane %v54_v12, %v62_v13  ;;  %s2311_s8 = sshll.u32 %s3141_s3, 4  ;;  %s2312_s8 = int_to_ptr.vmem [resolvable:$true] %s2311_s8 }
  0x30   :  { %2343 = vmatmul.mubr.msk.f32.gmra.mrb[10].mxu1 %vm76_vm0, %v43_v32  ;;  %2401 = vmatpush1.bf16.msra.mxu0 %v3306_v33  ;;  %v3406_v32 = vrot.slane %v54_v12, %v70_v20  ;;  %v3409_v40 = vrot.slane %v54_v12, %v66_v36  ;;  %s3111_s2 = scalar_lea.vmem %s2312_s8, 1024  ;;  %p3116_p9 = scmp.lt.s32.totalorder %s2312_s8, %s2312_s8 }
  0x31   :  { %2433 = vmatpush1.bf16.msra.mxu1 %v3310_v39  ;;  %201 = vmatprep.mubr.f32.mxu0 %v3140_v0  ;;  %p3112_p8 = scmp.ne.s32.totalorder %s2312_s8, %s3111_s2  ;;  %p3117_p10 = scmp.lt.s32.totalorder %s3111_s2, %s3111_s2 }
  0x32   :  { %314 = vmatprep.mubr.f32.mxu1 %v3140_v0  ;;  %2403 = vmatprep.subr.bf16.mxu0 %v3314_v43 }
  0x33   :  { %2336 = vmatmul.mubr.msk.f32.gmra.mrb[12].mxu0 %vm76_vm0, %v44_v51  ;;  %2435 = vmatprep.subr.bf16.mxu1 %v3318_v46  ;;  %p3118_p11 = por %p3117_p10, %p3116_p9 }
  0x34   :  { %2344 = vmatmul.mubr.msk.f32.gmra.mrb[12].mxu1 %vm76_vm0, %v44_v51  ;;  %2405 = vmatpush1.bf16.msra.mxu0 %v3325_v52 }
  0x35   :  { %2437 = vmatpush1.bf16.msra.mxu1 %v3329_v56  ;;  %207 = vmatprep.mubr.f32.mxu0 %v3140_v0  ;;  %p3119_p12 = pnand %p3118_p11, %p3112_p8 }
  0x36   :  { %320 = vmatprep.mubr.f32.mxu1 %v3140_v0  ;;  %2407 = vmatprep.subr.bf16.mxu0 %v3333_v60 }
  0x37   :  { %2337 = vmatmul.mubr.msk.f32.gmra.mrb[14].mxu0 %vm76_vm0, %v45_v3  ;;  %2439 = vmatprep.subr.bf16.mxu1 %v3337_v1 }
  0x38   :  { %2345 = vmatmul.mubr.msk.f32.gmra.mrb[14].mxu1 %vm76_vm0, %v45_v3  ;;  %2409 = vmatpush1.bf16.msra.mxu0 %v3344_v4 }
  0x39   :  { %2441 = vmatpush1.bf16.msra.mxu1 %v3348_v6  ;;  %496 = vmatprep.mubr.f32.mxu0 %v3140_v0 }
  0x3a   :  { %567 = vmatprep.mubr.f32.mxu1 %v3140_v0  ;;  %2443 = vmatprep.subr.bf16.mxu0 %v3210_v17 }
  0x3b   :  { %497 = vmatmul.mubr.f32.vlgmr.msra.gmra.mrb[0].mxu0 %v3140_v0  ;;  %2475 = vmatprep.subr.bf16.mxu1 %v3212_v21 }
  0x3c   :  { %568 = vmatmul.mubr.f32.vlgmr.msra.gmra.mrb[0].mxu1 %v3140_v0  ;;  %2445 = vmatpush1.bf16.msra.mxu0 %v3214_v22 }
  0x3d   :  { %2477 = vmatpush1.bf16.msra.mxu1 %v3217_v25  ;;  %2447 = vmatprep.subr.bf16.mxu0 %v3221_v29 }
  0x3e   :  { %2479 = vmatprep.subr.bf16.mxu1 %v3228_v34  ;;  %738 = vmatprep.mubr.f32.mxu0 %v3140_v0 }
  0x3f   :  { %809 = vmatprep.mubr.f32.mxu1 %v3140_v0 }
  0x40   :  { %2449 = vmatpush1.bf16.msra.mxu0 %v3230_v35 }
  0x41   :  { %2481 = vmatpush1.bf16.msra.mxu1 %v3234_v38  ;;  %2451 = vmatprep.subr.bf16.mxu0 %v3238_v42 }
  0x42   :  { %2483 = vmatprep.subr.bf16.mxu1 %v3245_v47 }
  0x44   :  { %2453 = vmatpush1.bf16.msra.mxu0 %v3249_v50 }
  0x45   :  { %2485 = vmatpush1.bf16.msra.mxu1 %v3253_v54  ;;  %2455 = vmatprep.subr.bf16.mxu0 %v3257_v58 }
  0x46   :  { %2487 = vmatprep.subr.bf16.mxu1 %v3261_v61 }
  0x48   :  { %2457 = vmatpush1.bf16.msra.mxu0 %v3268_v2 }
  0x49   :  { %2489 = vmatpush1.bf16.msra.mxu1 %v3272_v5  ;;  %2459 = vmatprep.subr.bf16.mxu0 %v3276_v8 }
  0x4a   :  { %2491 = vmatprep.subr.bf16.mxu1 %v3280_v11 }
  0x4c   :  { %2461 = vmatpush1.bf16.msra.mxu0 %v3287_v15 }
  0x4d   :  { %2493 = vmatpush1.bf16.msra.mxu1 %v3291_v19  ;;  %2463 = vmatprep.subr.bf16.mxu0 %v3295_v24 }
  0x4e   :  { %2495 = vmatprep.subr.bf16.mxu1 %v3299_v28 }
  0x50   :  { %2465 = vmatpush1.bf16.msra.mxu0 %v3306_v33 }
  0x51   :  { %2497 = vmatpush1.bf16.msra.mxu1 %v3310_v39  ;;  %2467 = vmatprep.subr.bf16.mxu0 %v3314_v43 }
  0x52   :  { %2499 = vmatprep.subr.bf16.mxu1 %v3318_v46 }
  0x54   :  { %2469 = vmatpush1.bf16.msra.mxu0 %v3325_v52 }
  0x55   :  { %2501 = vmatpush1.bf16.msra.mxu1 %v3329_v56  ;;  %2471 = vmatprep.subr.bf16.mxu0 %v3333_v60 }
  0x56   :  { %2503 = vmatprep.subr.bf16.mxu1 %v3337_v1 }
  0x58   :  { %2473 = vmatpush1.bf16.msra.mxu0 %v3344_v4 }
  0x59   :  { %2505 = vmatpush1.bf16.msra.mxu1 %v3348_v6  ;;  %2507 = vmatprep.subr.bf16.mxu0 %v3210_v17 }
  0x5a   :  { %2539 = vmatprep.subr.bf16.mxu1 %v3212_v21 }
 0x10e   :  { %v498_v18 = vpop.f32.mrb[0].mxu0 }
 0x10f   :  { %v2890_v23 = vadd.f32 %v498_v18, %v3400_v14  ;;  %v569_v26 = vpop.f32.mrb[0].mxu1  ;;  %v500_v17 = vpop.f32.mrb[1].mxu0 }
 0x110   :  { %v2891_v21 = vadd.f32 %v500_v17, %v3402_v16  ;;  %v571_v27 = vpop.f32.mrb[1].mxu1  ;;  %v2906_v44 = vadd.f32 %v569_v26, %v3409_v40 }
 0x111   :  { %v2346_v30 = vmul.f32 -1.442695, %v2890_v23  ;;  %v2907_v37 = vadd.f32 %v571_v27, %v3406_v32 }
 0x112   :  { %v2347_v31 = vmul.f32 -1.442695, %v2891_v21 }
 0x113   :  { %2961 = vpow2.f32 %v2346_v30  ;;  %v2348_v41 = vmul.f32 -1.442695, %v2907_v37 }
 0x114   :  { %2963 = vpow2.f32 %v2347_v31 }
 0x115   :  { %2965 = vpow2.f32 %v2348_v41 }
 0x116   :  { %2967 = vtanh.f32 %v2906_v44 }
 0x11d   :  { %v2962_v45 = vpop.eup %2961 }
 0x11e   :  { %v2964_v48 = vpop.eup %2963  ;;  %v581_v49 = vadd.f32 1.0, %v2962_v45 }
 0x11f   :  { %v587_v51 = vadd.f32 1.0, %v2964_v48  ;;  %v2966_v53 = vpop.eup %2965 }
 0x120   :  { %2969 = vrcp.f32 %v581_v49  ;;  %v2968_v55 = vpop.eup %2967  ;;  %v594_v63 = vadd.f32 1.0, %v2966_v53 }
 0x121   :  { %2971 = vrcp.f32 %v587_v51 }
 0x122   :  { %2973 = vrcp.f32 %v594_v63 }
 0x12a   :  { %v2970_v57 = vpop.eup %2969 }
 0x12b   :  { %v2972_v59 = vpop.eup %2971  ;;  %v598_v62 = vmul.f32 %v2970_v57, %v2968_v55  ;;  %v1097_v57 = vld [vmem:[#allocation5 + $0x8] sm:$0xff] }
 0x12c   :  { %v597_v3 = vmul.f32 0.0, %v2972_v59  ;;  %v2974_v9 = vpop.eup %2973  ;;  %v1101_v59 = vld [vmem:[#allocation5 + $0x28] sm:$0xff] }
 0x12d   :  { %v3457_v63 = vpack.c.bf16 %v1101_v59, %v1097_v57  ;;  %v1357_v57 = vld [vmem:[#allocation5 + $0x90] sm:$0xff] }
 0x12e   :  { %v3412_v7 = vadd.f32 %v598_v62, %v597_v3  ;;  %v1099_v62 = vld [vmem:[#allocation5 + $0x18] sm:$0xff]  ;;  %v1361_v59 = vld [vmem:[#allocation5 + $0xb0] sm:$0xff] }
 0x12f   :  { %v1103_v3 = vld [vmem:[#allocation5 + $0x38] sm:$0xff] }
 0x130   :  { %2975 = vtanh.f32 %v3412_v7 }
 0x13a   :  { %v2976_v10 = vpop.eup %2975 }
 0x13b   :  { %v601_v12 = vmul.f32 %v2976_v10, %v2974_v9  ;;  %v1100_v9 = vld [vmem:[#allocation5 + $0x20] sm:$0xff]  ;;  %v3459_v10 = vpack.c.bf16 %v1103_v3, %v1099_v62  ;;  %v3530_v62 = vpack.c.bf16 %v1361_v59, %v1357_v57  ;;  %v1364_v3 = vld [vmem:[#allocation5 + $0xc8] sm:$0xff]  ;;  %v1389_v57 = vld [vmem:[#allocation5 + $0x190] sm:$0xff] }
 0x13d   :  { %602 = vst [vmem:[#allocation8] sm:$0xff] %v601_v12  ;;  %739 = vmatmul.mubr.f32.vlgmr.msra.gmra.mrb[2].mxu0 %v601_v12  ;;  %810 = vmatmul.mubr.f32.vlgmr.msra.gmra.mrb[2].mxu1 %v601_v12 }
 0x13e   :  { %2509 = vmatpush1.bf16.msra.mxu0 %v3214_v22  ;;  %2541 = vmatpush1.bf16.msra.mxu1 %v3217_v25 }
 0x13f   :  { %2511 = vmatprep.subr.bf16.mxu0 %v3221_v29  ;;  %2543 = vmatprep.subr.bf16.mxu1 %v3228_v34 }
 0x140   :  { %981 = vmatprep.mubr.f32.mxu0 %v3140_v0  ;;  %1052 = vmatprep.mubr.f32.mxu1 %v3140_v0 }
 0x142   :  { %2513 = vmatpush1.bf16.msra.mxu0 %v3230_v35  ;;  %2545 = vmatpush1.bf16.msra.mxu1 %v3234_v38 }
 0x143   :  { %2515 = vmatprep.subr.bf16.mxu0 %v3238_v42  ;;  %2547 = vmatprep.subr.bf16.mxu1 %v3245_v47 }
 0x146   :  { %2517 = vmatpush1.bf16.msra.mxu0 %v3249_v50  ;;  %2549 = vmatpush1.bf16.msra.mxu1 %v3253_v54 }
 0x147   :  { %2519 = vmatprep.subr.bf16.mxu0 %v3257_v58  ;;  %2551 = vmatprep.subr.bf16.mxu1 %v3261_v61 }
 0x14a   :  { %2521 = vmatpush1.bf16.msra.mxu0 %v3268_v2  ;;  %2553 = vmatpush1.bf16.msra.mxu1 %v3272_v5 }
 0x14b   :  { %2523 = vmatprep.subr.bf16.mxu0 %v3276_v8  ;;  %2555 = vmatprep.subr.bf16.mxu1 %v3280_v11 }
 0x14e   :  { %2525 = vmatpush1.bf16.msra.mxu0 %v3287_v15  ;;  %2557 = vmatpush1.bf16.msra.mxu1 %v3291_v19 }
 0x14f   :  { %2527 = vmatprep.subr.bf16.mxu0 %v3295_v24  ;;  %2559 = vmatprep.subr.bf16.mxu1 %v3299_v28 }
 0x152   :  { %2529 = vmatpush1.bf16.msra.mxu0 %v3306_v33  ;;  %2561 = vmatpush1.bf16.msra.mxu1 %v3310_v39 }
 0x153   :  { %2531 = vmatprep.subr.bf16.mxu0 %v3314_v43  ;;  %2563 = vmatprep.subr.bf16.mxu1 %v3318_v46 }
 0x156   :  { %2533 = vmatpush1.bf16.msra.mxu0 %v3325_v52  ;;  %2565 = vmatpush1.bf16.msra.mxu1 %v3329_v56 }
 0x157   :  { %2535 = vmatprep.subr.bf16.mxu0 %v3333_v60  ;;  %2567 = vmatprep.subr.bf16.mxu1 %v3337_v1 }
 0x15a   :  { %2537 = vmatpush1.bf16.msra.mxu0 %v3344_v4  ;;  %2569 = vmatpush1.bf16.msra.mxu1 %v3348_v6 }
 0x15b   :  { %2571 = vmatprep.subr.bf16.mxu0 %v3457_v63  ;;  %2603 = vmatprep.subr.bf16.mxu1 %v3459_v10 }
 0x210   :  { %v740_v22 = vpop.f32.mrb[2].mxu0  ;;  %v811_v25 = vpop.f32.mrb[2].mxu1 }
 0x211   :  { %v2892_v29 = vadd.f32 %v740_v22, %v3400_v14  ;;  %v742_v34 = vpop.f32.mrb[3].mxu0  ;;  %v813_v35 = vpop.f32.mrb[3].mxu1  ;;  %v2908_v26 = vadd.f32 %v811_v25, %v3409_v40  ;;  %v1098_v22 = vld [vmem:[#allocation5 + $0x10] sm:$0xff] }
 0x212   :  { %v2893_v38 = vadd.f32 %v742_v34, %v3402_v16  ;;  %v2909_v20 = vadd.f32 %v813_v35, %v3406_v32  ;;  %v1102_v25 = vld [vmem:[#allocation5 + $0x30] sm:$0xff]  ;;  %v1105_v34 = vld [vmem:[#allocation5 + $0x48] sm:$0xff] }
 0x213   :  { %v2349_v13 = vmul.f32 -1.442695, %v2892_v29  ;;  %v3464_v29 = vpack.c.bf16 %v1102_v25, %v1098_v22  ;;  %v1109_v35 = vld [vmem:[#allocation5 + $0x68] sm:$0xff]  ;;  %v1370_v25 = vld [vmem:[#allocation5 + $0xf8] sm:$0xff] }
 0x214   :  { %v2350_v18 = vmul.f32 -1.442695, %v2893_v38  ;;  %v2351_v23 = vmul.f32 -1.442695, %v2909_v20  ;;  %v1107_v38 = vld [vmem:[#allocation5 + $0x58] sm:$0xff]  ;;  %v1104_v20 = vld [vmem:[#allocation5 + $0x40] sm:$0xff] }
 0x215   :  { %2977 = vpow2.f32 %v2349_v13  ;;  %v3469_v13 = vpack.c.bf16 %v1109_v35, %v1105_v34  ;;  %v1363_v34 = vld [vmem:[#allocation5 + $0xc0] sm:$0xff] }
 0x216   :  { %2979 = vpow2.f32 %v2350_v18  ;;  %v1111_v18 = vld [vmem:[#allocation5 + $0x78] sm:$0xff]  ;;  %v1367_v35 = vld [vmem:[#allocation5 + $0xe0] sm:$0xff] }
 0x217   :  { %2981 = vpow2.f32 %v2351_v23  ;;  %v1108_v23 = vld [vmem:[#allocation5 + $0x60] sm:$0xff] }
 0x218   :  { %2983 = vtanh.f32 %v2908_v26  ;;  %v3471_v26 = vpack.c.bf16 %v1111_v18, %v1107_v38  ;;  %v3539_v18 = vpack.c.bf16 %v1367_v35, %v1363_v34  ;;  %v1398_v35 = vld [vmem:[#allocation5 + $0x1d8] sm:$0xff] }
 0x21f   :  { %v2978_v17 = vpop.eup %2977 }
 0x220   :  { %v2980_v21 = vpop.eup %2979  ;;  %v823_v27 = vadd.f32 1.0, %v2978_v17  ;;  %v3473_v17 = vpack.c.bf16 %v1108_v23, %v1104_v20  ;;  %v1365_v20 = vld [vmem:[#allocation5 + $0xd0] sm:$0xff] }
 0x221   :  { %v829_v30 = vadd.f32 1.0, %v2980_v21  ;;  %v2982_v31 = vpop.eup %2981  ;;  %v1106_v21 = vld [vmem:[#allocation5 + $0x50] sm:$0xff] }
 0x222   :  { %2985 = vrcp.f32 %v823_v27  ;;  %v2984_v36 = vpop.eup %2983  ;;  %v836_v45 = vadd.f32 1.0, %v2982_v31  ;;  %v1110_v27 = vld [vmem:[#allocation5 + $0x70] sm:$0xff] }
 0x223   :  { %2987 = vrcp.f32 %v829_v30  ;;  %v3476_v30 = vpack.c.bf16 %v1110_v27, %v1106_v21  ;;  %v1369_v23 = vld [vmem:[#allocation5 + $0xf0] sm:$0xff]  ;;  %v1372_v27 = vld [vmem:[#allocation5 + $0x108] sm:$0xff] }
 0x224   :  { %2989 = vrcp.f32 %v836_v45  ;;  %v3542_v21 = vpack.c.bf16 %v1369_v23, %v1365_v20  ;;  %v1402_v20 = vld [vmem:[#allocation5 + $0x1f8] sm:$0xff]  ;;  %v1395_v23 = vld [vmem:[#allocation5 + $0x1c0] sm:$0xff] }
 0x22c   :  { %v2986_v37 = vpop.eup %2985 }
 0x22d   :  { %v2988_v41 = vpop.eup %2987  ;;  %v840_v44 = vmul.f32 %v2986_v37, %v2984_v36  ;;  %v1356_v37 = vld [vmem:[#allocation5 + $0x88] sm:$0xff] }
 0x22e   :  { %v839_v48 = vmul.f32 %v2988_v41, %v3412_v7  ;;  %v2990_v51 = vpop.eup %2989  ;;  %v1096_v7 = vld [vmem:[#allocation5] sm:$0xff]  ;;  %v1360_v41 = vld [vmem:[#allocation5 + $0xa8] sm:$0xff] }
 0x22f   :  { %v3461_v12 = vpack.c.bf16 %v1100_v9, %v1096_v7  ;;  %v3523_v45 = vpack.c.bf16 %v1360_v41, %v1356_v37  ;;  %v1368_v7 = vld [vmem:[#allocation5 + $0xe8] sm:$0xff]  ;;  %v1366_v9 = vld [vmem:[#allocation5 + $0xd8] sm:$0xff] }
 0x230   :  { %v3452_v49 = vadd.f32 %v840_v44, %v839_v48  ;;  %v1358_v44 = vld [vmem:[#allocation5 + $0x98] sm:$0xff]  ;;  %v3535_v22 = vpack.c.bf16 %v1368_v7, %v1364_v3  ;;  %v3537_v38 = vpack.c.bf16 %v1370_v25, %v1366_v9  ;;  %v1393_v3 = vld [vmem:[#allocation5 + $0x1b0] sm:$0xff]  ;;  %v1396_v7 = vld [vmem:[#allocation5 + $0x1c8] sm:$0xff] }
 0x231   :  { %v1362_v48 = vld [vmem:[#allocation5 + $0xb8] sm:$0xff]  ;;  %v1400_v9 = vld [vmem:[#allocation5 + $0x1e8] sm:$0xff]  ;;  %v3578_v25 = vpack.c.bf16 %v1393_v3, %v1389_v57 }
 0x232   :  { %2991 = vtanh.f32 %v3452_v49  ;;  %v1390_v37 = vld [vmem:[#allocation5 + $0x198] sm:$0xff]  ;;  %v3580_v34 = vpack.c.bf16 %v1400_v9, %v1396_v7 }
 0x233   :  { %v1394_v41 = vld [vmem:[#allocation5 + $0x1b8] sm:$0xff] }
 0x23c   :  { %v2992_v53 = vpop.eup %2991 }
 0x23d   :  { %v843_v55 = vmul.f32 %v2992_v53, %v2990_v51  ;;  %v1359_v51 = vld [vmem:[#allocation5 + $0xa0] sm:$0xff]  ;;  %v3525_v53 = vpack.c.bf16 %v1362_v48, %v1358_v44  ;;  %v3571_v48 = vpack.c.bf16 %v1394_v41, %v1390_v37 }
 0x23f   :  { %845 = vst [vmem:[#allocation8 + $0x8] sm:$0xff] %v843_v55  ;;  %982 = vmatmul.mubr.f32.vlgmr.msra.gmra.mrb[4].mxu0 %v843_v55  ;;  %1053 = vmatmul.mubr.f32.vlgmr.msra.gmra.mrb[4].mxu1 %v843_v55 }
 0x240   :  { %1224 = vmatprep.mubr.f32.mxu0 %v3140_v0  ;;  %1295 = vmatprep.mubr.f32.mxu1 %v3140_v0 }
 0x241   :  { %2573 = vmatpush1.bf16.msra.mxu0 %v3461_v12  ;;  %2605 = vmatpush1.bf16.msra.mxu1 %v3464_v29 }
 0x242   :  { %2575 = vmatprep.subr.bf16.mxu0 %v3469_v13  ;;  %2607 = vmatprep.subr.bf16.mxu1 %v3471_v26 }
 0x245   :  { %2577 = vmatpush1.bf16.msra.mxu0 %v3473_v17  ;;  %2609 = vmatpush1.bf16.msra.mxu1 %v3476_v30 }
 0x246   :  { %2579 = vmatprep.subr.bf16.mxu0 %v3238_v42  ;;  %2611 = vmatprep.subr.bf16.mxu1 %v3245_v47 }
 0x249   :  { %2581 = vmatpush1.bf16.msra.mxu0 %v3249_v50  ;;  %2613 = vmatpush1.bf16.msra.mxu1 %v3253_v54 }
 0x24a   :  { %2583 = vmatprep.subr.bf16.mxu0 %v3257_v58  ;;  %2615 = vmatprep.subr.bf16.mxu1 %v3261_v61 }
 0x24d   :  { %2585 = vmatpush1.bf16.msra.mxu0 %v3268_v2  ;;  %2617 = vmatpush1.bf16.msra.mxu1 %v3272_v5 }
 0x24e   :  { %2587 = vmatprep.subr.bf16.mxu0 %v3276_v8  ;;  %2619 = vmatprep.subr.bf16.mxu1 %v3280_v11 }
 0x251   :  { %2589 = vmatpush1.bf16.msra.mxu0 %v3287_v15  ;;  %2621 = vmatpush1.bf16.msra.mxu1 %v3291_v19 }
 0x252   :  { %2591 = vmatprep.subr.bf16.mxu0 %v3295_v24  ;;  %2623 = vmatprep.subr.bf16.mxu1 %v3299_v28 }
 0x255   :  { %2593 = vmatpush1.bf16.msra.mxu0 %v3306_v33  ;;  %2625 = vmatpush1.bf16.msra.mxu1 %v3310_v39 }
 0x256   :  { %2595 = vmatprep.subr.bf16.mxu0 %v3314_v43  ;;  %2627 = vmatprep.subr.bf16.mxu1 %v3318_v46 }
 0x259   :  { %2597 = vmatpush1.bf16.msra.mxu0 %v3325_v52  ;;  %2629 = vmatpush1.bf16.msra.mxu1 %v3329_v56 }
 0x25a   :  { %2599 = vmatprep.subr.bf16.mxu0 %v3333_v60  ;;  %2631 = vmatprep.subr.bf16.mxu1 %v3337_v1 }
 0x25d   :  { %2601 = vmatpush1.bf16.msra.mxu0 %v3344_v4  ;;  %2633 = vmatpush1.bf16.msra.mxu1 %v3348_v6 }
 0x25e   :  { %2635 = vmatprep.subr.bf16.mxu0 %v3457_v63  ;;  %2667 = vmatprep.subr.bf16.mxu1 %v3459_v10 }
 0x312   :  { %v983_v42 = vpop.f32.mrb[4].mxu0  ;;  %v1054_v47 = vpop.f32.mrb[4].mxu1 }
 0x313   :  { %v2894_v50 = vadd.f32 %v983_v42, %v3400_v14  ;;  %v985_v54 = vpop.f32.mrb[5].mxu0  ;;  %v1056_v58 = vpop.f32.mrb[5].mxu1  ;;  %v2910_v15 = vadd.f32 %v1054_v47, %v3409_v40  ;;  %v1376_v42 = vld [vmem:[#allocation5 + $0x128] sm:$0xff]  ;;  %v1374_v47 = vld [vmem:[#allocation5 + $0x118] sm:$0xff] }
 0x314   :  { %v2895_v61 = vadd.f32 %v985_v54, %v3402_v16  ;;  %v2911_v8 = vadd.f32 %v1056_v58, %v3406_v32  ;;  %v1378_v54 = vld [vmem:[#allocation5 + $0x138] sm:$0xff]  ;;  %v1371_v58 = vld [vmem:[#allocation5 + $0x100] sm:$0xff] }
 0x315   :  { %v2352_v2 = vmul.f32 -1.442695, %v2894_v50  ;;  %v3547_v50 = vpack.c.bf16 %v1376_v42, %v1372_v27  ;;  %v3583_v27 = vpack.c.bf16 %v1402_v20, %v1398_v35  ;;  %v1399_v42 = vld [vmem:[#allocation5 + $0x1e0] sm:$0xff] }
 0x316   :  { %v2353_v5 = vmul.f32 -1.442695, %v2895_v61  ;;  %v2354_v11 = vmul.f32 -1.442695, %v2911_v8  ;;  %v1375_v61 = vld [vmem:[#allocation5 + $0x120] sm:$0xff]  ;;  %v1373_v8 = vld [vmem:[#allocation5 + $0x110] sm:$0xff] }
 0x317   :  { %2993 = vpow2.f32 %v2352_v2  ;;  %v3549_v2 = vpack.c.bf16 %v1378_v54, %v1374_v47  ;;  %v1397_v47 = vld [vmem:[#allocation5 + $0x1d0] sm:$0xff] }
 0x318   :  { %2995 = vpow2.f32 %v2353_v5  ;;  %v3551_v5 = vpack.c.bf16 %v1375_v61, %v1371_v58  ;;  %v1401_v54 = vld [vmem:[#allocation5 + $0x1f0] sm:$0xff]  ;;  %v3586_v58 = vpack.c.bf16 %v1399_v42, %v1395_v23 }
 0x319   :  { %2997 = vpow2.f32 %v2354_v11  ;;  %v1377_v11 = vld [vmem:[#allocation5 + $0x130] sm:$0xff]  ;;  %v3590_v61 = vpack.c.bf16 %v1401_v54, %v1397_v47 }
 0x31a   :  { %2999 = vtanh.f32 %v2910_v15  ;;  %v3554_v15 = vpack.c.bf16 %v1377_v11, %v1373_v8 }
 0x321   :  { %v2994_v19 = vpop.eup %2993 }
 0x322   :  { %v2996_v24 = vpop.eup %2995  ;;  %v1066_v28 = vadd.f32 1.0, %v2994_v19  ;;  %v1380_v19 = vld [vmem:[#allocation5 + $0x148] sm:$0xff] }
 0x323   :  { %v1072_v33 = vadd.f32 1.0, %v2996_v24  ;;  %v2998_v39 = vpop.eup %2997  ;;  %v1384_v24 = vld [vmem:[#allocation5 + $0x168] sm:$0xff] }
 0x324   :  { %3001 = vrcp.f32 %v1066_v28  ;;  %v3000_v43 = vpop.eup %2999  ;;  %v1079_v60 = vadd.f32 1.0, %v2998_v39  ;;  %v1382_v28 = vld [vmem:[#allocation5 + $0x158] sm:$0xff] }
 0x325   :  { %3003 = vrcp.f32 %v1072_v33  ;;  %v3558_v33 = vpack.c.bf16 %v1384_v24, %v1380_v19  ;;  %v1386_v39 = vld [vmem:[#allocation5 + $0x178] sm:$0xff] }
 0x326   :  { %3005 = vrcp.f32 %v1079_v60  ;;  %v1381_v60 = vld [vmem:[#allocation5 + $0x150] sm:$0xff] }
 0x32e   :  { %v3002_v46 = vpop.eup %3001 }
 0x32f   :  { %v3004_v52 = vpop.eup %3003  ;;  %v1083_v56 = vmul.f32 %v3002_v46, %v3000_v43  ;;  %v1379_v43 = vld [vmem:[#allocation5 + $0x140] sm:$0xff] }
 0x330   :  { %v1082_v1 = vmul.f32 %v3004_v52, %v3452_v49  ;;  %v3006_v6 = vpop.eup %3005  ;;  %v1355_v49 = vld [vmem:[#allocation5 + $0x80] sm:$0xff]  ;;  %v3561_v52 = vpack.c.bf16 %v1386_v39, %v1382_v28 }
 0x331   :  { %v3527_v55 = vpack.c.bf16 %v1359_v51, %v1355_v49  ;;  %v1383_v46 = vld [vmem:[#allocation5 + $0x160] sm:$0xff] }
 0x332   :  { %v3512_v4 = vadd.f32 %v1083_v56, %v1082_v1  ;;  %v3563_v56 = vpack.c.bf16 %v1383_v46, %v1379_v43  ;;  %v1385_v1 = vld [vmem:[#allocation5 + $0x170] sm:$0xff]  ;;  %v1387_v49 = vld [vmem:[#allocation5 + $0x180] sm:$0xff] }
 0x333   :  { %v1391_v51 = vld [vmem:[#allocation5 + $0x1a0] sm:$0xff] }
 0x334   :  { %3007 = vtanh.f32 %v3512_v4  ;;  %v3574_v59 = vpack.c.bf16 %v1391_v51, %v1387_v49 }
 0x33e   :  { %v3008_v31 = vpop.eup %3007 }
 0x33f   :  { %v1086_v36 = vmul.f32 %v3008_v31, %v3006_v6  ;;  %v1388_v6 = vld [vmem:[#allocation5 + $0x188] sm:$0xff]  ;;  %v3566_v31 = vpack.c.bf16 %v1385_v1, %v1381_v60 }
 0x341   :  { %1088 = vst [vmem:[#allocation8 + $0x10] sm:$0xff] %v1086_v36  ;;  %1225 = vmatmul.mubr.f32.vlgmr.msra.gmra.mrb[6].mxu0 %v1086_v36  ;;  %1296 = vmatmul.mubr.f32.vlgmr.msra.gmra.mrb[6].mxu1 %v1086_v36  ;;  %v1392_v36 = vld [vmem:[#allocation5 + $0x1a8] sm:$0xff] }
 0x342   :  { %2637 = vmatpush1.bf16.msra.mxu0 %v3461_v12  ;;  %2669 = vmatpush1.bf16.msra.mxu1 %v3464_v29  ;;  %v3569_v44 = vpack.c.bf16 %v1392_v36, %v1388_v6 }
 0x343   :  { %2639 = vmatprep.subr.bf16.mxu0 %v3469_v13  ;;  %2671 = vmatprep.subr.bf16.mxu1 %v3471_v26 }
 0x344   :  { %1467 = vmatprep.mubr.f32.mxu0 %v3140_v0  ;;  %1538 = vmatprep.mubr.f32.mxu1 %v3140_v0 }
 0x346   :  { %2641 = vmatpush1.bf16.msra.mxu0 %v3473_v17  ;;  %2673 = vmatpush1.bf16.msra.mxu1 %v3476_v30 }
 0x347   :  { %2643 = vmatprep.subr.bf16.mxu0 %v3523_v45  ;;  %2675 = vmatprep.subr.bf16.mxu1 %v3525_v53 }
 0x34a   :  { %2645 = vmatpush1.bf16.msra.mxu0 %v3527_v55  ;;  %2677 = vmatpush1.bf16.msra.mxu1 %v3530_v62 }
 0x34b   :  { %2647 = vmatprep.subr.bf16.mxu0 %v3535_v22  ;;  %2679 = vmatprep.subr.bf16.mxu1 %v3537_v38 }
 0x34e   :  { %2649 = vmatpush1.bf16.msra.mxu0 %v3539_v18  ;;  %2681 = vmatpush1.bf16.msra.mxu1 %v3542_v21 }
 0x34f   :  { %2651 = vmatprep.subr.bf16.mxu0 %v3547_v50  ;;  %2683 = vmatprep.subr.bf16.mxu1 %v3549_v2 }
 0x352   :  { %2653 = vmatpush1.bf16.msra.mxu0 %v3551_v5  ;;  %2685 = vmatpush1.bf16.msra.mxu1 %v3554_v15 }
 0x353   :  { %2655 = vmatprep.subr.bf16.mxu0 %v3558_v33  ;;  %2687 = vmatprep.subr.bf16.mxu1 %v3561_v52 }
 0x356   :  { %2657 = vmatpush1.bf16.msra.mxu0 %v3563_v56  ;;  %2689 = vmatpush1.bf16.msra.mxu1 %v3566_v31 }
 0x357   :  { %2659 = vmatprep.subr.bf16.mxu0 %v3569_v44  ;;  %2691 = vmatprep.subr.bf16.mxu1 %v3571_v48 }
 0x35a   :  { %2661 = vmatpush1.bf16.msra.mxu0 %v3574_v59  ;;  %2693 = vmatpush1.bf16.msra.mxu1 %v3578_v25 }
 0x35b   :  { %2663 = vmatprep.subr.bf16.mxu0 %v3580_v34  ;;  %2695 = vmatprep.subr.bf16.mxu1 %v3583_v27 }
 0x35e   :  { %2665 = vmatpush1.bf16.msra.mxu0 %v3586_v58  ;;  %2697 = vmatpush1.bf16.msra.mxu1 %v3590_v61 }
 0x35f   :  { %2699 = vmatprep.subr.bf16.mxu0 %v3457_v63  ;;  %2731 = vmatprep.subr.bf16.mxu1 %v3459_v10 }
 0x414   :  { %v1226_v8 = vpop.f32.mrb[6].mxu0  ;;  %v1297_v11 = vpop.f32.mrb[6].mxu1 }
 0x415   :  { %v2896_v19 = vadd.f32 %v1226_v8, %v3400_v14  ;;  %v1228_v24 = vpop.f32.mrb[7].mxu0  ;;  %v1299_v28 = vpop.f32.mrb[7].mxu1  ;;  %v2912_v6 = vadd.f32 %v1297_v11, %v3409_v40 }
 0x416   :  { %v2897_v39 = vadd.f32 %v1228_v24, %v3402_v16  ;;  %v2913_v60 = vadd.f32 %v1299_v28, %v3406_v32 }
 0x417   :  { %v2355_v43 = vmul.f32 -1.442695, %v2896_v19 }
 0x418   :  { %v2356_v46 = vmul.f32 -1.442695, %v2897_v39  ;;  %v2357_v1 = vmul.f32 -1.442695, %v2913_v60 }
 0x419   :  { %3009 = vpow2.f32 %v2355_v43 }
 0x41a   :  { %3011 = vpow2.f32 %v2356_v46 }
 0x41b   :  { %3013 = vpow2.f32 %v2357_v1 }
 0x41c   :  { %3015 = vtanh.f32 %v2912_v6 }
 0x423   :  { %v3010_v36 = vpop.eup %3009 }
 0x424   :  { %v3012_v37 = vpop.eup %3011  ;;  %v1309_v41 = vadd.f32 1.0, %v3010_v36 }
 0x425   :  { %v1315_v49 = vadd.f32 1.0, %v3012_v37  ;;  %v3014_v51 = vpop.eup %3013 }
 0x426   :  { %3017 = vrcp.f32 %v1309_v41  ;;  %v3016_v57 = vpop.eup %3015  ;;  %v1322_v35 = vadd.f32 1.0, %v3014_v51 }
 0x427   :  { %3019 = vrcp.f32 %v1315_v49 }
 0x428   :  { %3021 = vrcp.f32 %v1322_v35 }
 0x430   :  { %v3018_v3 = vpop.eup %3017 }
 0x431   :  { %v3020_v7 = vpop.eup %3019  ;;  %v1326_v9 = vmul.f32 %v3018_v3, %v3016_v57 }
 0x432   :  { %v1325_v20 = vmul.f32 %v3020_v7, %v3512_v4  ;;  %v3022_v42 = vpop.eup %3021 }
 0x434   :  { %v3602_v23 = vadd.f32 %v1326_v9, %v1325_v20 }
 0x436   :  { %3023 = vtanh.f32 %v3602_v23 }
 0x440   :  { %v3024_v47 = vpop.eup %3023 }
 0x441   :  { %v1329_v54 = vmul.f32 %v3024_v47, %v3022_v42 }
 0x443   :  { %1331 = vst [vmem:[#allocation8 + $0x18] sm:$0xff] %v1329_v54  ;;  %1468 = vmatmul.mubr.f32.vlgmr.msra.gmra.mrb[8].mxu0 %v1329_v54  ;;  %1539 = vmatmul.mubr.f32.vlgmr.msra.gmra.mrb[8].mxu1 %v1329_v54 }
 0x444   :  { %2701 = vmatpush1.bf16.msra.mxu0 %v3461_v12  ;;  %2733 = vmatpush1.bf16.msra.mxu1 %v3464_v29 }
 0x445   :  { %2703 = vmatprep.subr.bf16.mxu0 %v3469_v13  ;;  %2735 = vmatprep.subr.bf16.mxu1 %v3471_v26 }
 0x446   :  { %1710 = vmatprep.mubr.f32.mxu0 %v3140_v0  ;;  %1781 = vmatprep.mubr.f32.mxu1 %v3140_v0 }
 0x448   :  { %2705 = vmatpush1.bf16.msra.mxu0 %v3473_v17  ;;  %2737 = vmatpush1.bf16.msra.mxu1 %v3476_v30 }
 0x449   :  { %2707 = vmatprep.subr.bf16.mxu0 %v3523_v45  ;;  %2739 = vmatprep.subr.bf16.mxu1 %v3525_v53 }
 0x44c   :  { %2709 = vmatpush1.bf16.msra.mxu0 %v3527_v55  ;;  %2741 = vmatpush1.bf16.msra.mxu1 %v3530_v62 }
 0x44d   :  { %2711 = vmatprep.subr.bf16.mxu0 %v3535_v22  ;;  %2743 = vmatprep.subr.bf16.mxu1 %v3537_v38 }
 0x450   :  { %2713 = vmatpush1.bf16.msra.mxu0 %v3539_v18  ;;  %2745 = vmatpush1.bf16.msra.mxu1 %v3542_v21 }
 0x451   :  { %2715 = vmatprep.subr.bf16.mxu0 %v3547_v50  ;;  %2747 = vmatprep.subr.bf16.mxu1 %v3549_v2 }
 0x454   :  { %2717 = vmatpush1.bf16.msra.mxu0 %v3551_v5  ;;  %2749 = vmatpush1.bf16.msra.mxu1 %v3554_v15 }
 0x455   :  { %2719 = vmatprep.subr.bf16.mxu0 %v3558_v33  ;;  %2751 = vmatprep.subr.bf16.mxu1 %v3561_v52 }
 0x458   :  { %2721 = vmatpush1.bf16.msra.mxu0 %v3563_v56  ;;  %2753 = vmatpush1.bf16.msra.mxu1 %v3566_v31 }
 0x459   :  { %2723 = vmatprep.subr.bf16.mxu0 %v3569_v44  ;;  %2755 = vmatprep.subr.bf16.mxu1 %v3571_v48 }
 0x45c   :  { %2725 = vmatpush1.bf16.msra.mxu0 %v3574_v59  ;;  %2757 = vmatpush1.bf16.msra.mxu1 %v3578_v25 }
 0x45d   :  { %2727 = vmatprep.subr.bf16.mxu0 %v3580_v34  ;;  %2759 = vmatprep.subr.bf16.mxu1 %v3583_v27 }
 0x460   :  { %2729 = vmatpush1.bf16.msra.mxu0 %v3586_v58  ;;  %2761 = vmatpush1.bf16.msra.mxu1 %v3590_v61 }
 0x461   :  { %2763 = vmatprep.subr.bf16.mxu0 %v3457_v63  ;;  %2795 = vmatprep.subr.bf16.mxu1 %v3459_v10 }
 0x516   :  { %v1469_v4 = vpop.f32.mrb[8].mxu0  ;;  %v1540_v8 = vpop.f32.mrb[8].mxu1 }
 0x517   :  { %v2898_v11 = vadd.f32 %v1469_v4, %v3400_v14  ;;  %v1471_v19 = vpop.f32.mrb[9].mxu0  ;;  %v1542_v24 = vpop.f32.mrb[9].mxu1  ;;  %v2914_v1 = vadd.f32 %v1540_v8, %v3409_v40 }
 0x518   :  { %v2899_v28 = vadd.f32 %v1471_v19, %v3402_v16  ;;  %v2915_v46 = vadd.f32 %v1542_v24, %v3406_v32 }
 0x519   :  { %v2358_v39 = vmul.f32 -1.442695, %v2898_v11 }
 0x51a   :  { %v2359_v43 = vmul.f32 -1.442695, %v2899_v28  ;;  %v2360_v60 = vmul.f32 -1.442695, %v2915_v46 }
 0x51b   :  { %3025 = vpow2.f32 %v2358_v39 }
 0x51c   :  { %3027 = vpow2.f32 %v2359_v43 }
 0x51d   :  { %3029 = vpow2.f32 %v2360_v60 }
 0x51e   :  { %3031 = vtanh.f32 %v2914_v1 }
 0x525   :  { %v3026_v63 = vpop.eup %3025 }
 0x526   :  { %v3028_v6 = vpop.eup %3027  ;;  %v1552_v10 = vadd.f32 1.0, %v3026_v63 }
 0x527   :  { %v1558_v36 = vadd.f32 1.0, %v3028_v6  ;;  %v3030_v37 = vpop.eup %3029 }
 0x528   :  { %3033 = vrcp.f32 %v1552_v10  ;;  %v3032_v41 = vpop.eup %3031  ;;  %v1565_v3 = vadd.f32 1.0, %v3030_v37 }
 0x529   :  { %3035 = vrcp.f32 %v1558_v36 }
 0x52a   :  { %3037 = vrcp.f32 %v1565_v3 }
 0x532   :  { %v3034_v49 = vpop.eup %3033 }
 0x533   :  { %v3036_v51 = vpop.eup %3035  ;;  %v1569_v57 = vmul.f32 %v3034_v49, %v3032_v41  ;;  %v2069_v49 = vld [vmem:[#allocation5 + $0x8] sm:$0xff] }
 0x534   :  { %v1568_v7 = vmul.f32 %v3036_v51, %v3602_v23  ;;  %v3038_v35 = vpop.eup %3037  ;;  %v2073_v51 = vld [vmem:[#allocation5 + $0x28] sm:$0xff] }
 0x535   :  { %v2826_v3 = vpack.c.bf16 %v2073_v51, %v2069_v49 }
 0x536   :  { %v3644_v9 = vadd.f32 %v1569_v57, %v1568_v7  ;;  %v2071_v57 = vld [vmem:[#allocation5 + $0x18] sm:$0xff] }
 0x537   :  { %v2075_v7 = vld [vmem:[#allocation5 + $0x38] sm:$0xff] }
 0x538   :  { %3039 = vtanh.f32 %v3644_v9 }
 0x542   :  { %v3040_v20 = vpop.eup %3039 }
 0x543   :  { %v1572_v42 = vmul.f32 %v3040_v20, %v3038_v35  ;;  %v2072_v35 = vld [vmem:[#allocation5 + $0x20] sm:$0xff]  ;;  %v2858_v20 = vpack.c.bf16 %v2075_v7, %v2071_v57 }
 0x545   :  { %1574 = vst [vmem:[#allocation8 + $0x20] sm:$0xff] %v1572_v42  ;;  %1711 = vmatmul.mubr.f32.vlgmr.msra.gmra.mrb[10].mxu0 %v1572_v42  ;;  %1782 = vmatmul.mubr.f32.vlgmr.msra.gmra.mrb[10].mxu1 %v1572_v42 }
 0x546   :  { %2765 = vmatpush1.bf16.msra.mxu0 %v3461_v12  ;;  %2797 = vmatpush1.bf16.msra.mxu1 %v3464_v29 }
 0x547   :  { %2767 = vmatprep.subr.bf16.mxu0 %v3469_v13  ;;  %2799 = vmatprep.subr.bf16.mxu1 %v3471_v26 }
 0x548   :  { %1953 = vmatprep.mubr.f32.mxu0 %v3140_v0  ;;  %2024 = vmatprep.mubr.f32.mxu1 %v3140_v0 }
 0x54a   :  { %2769 = vmatpush1.bf16.msra.mxu0 %v3473_v17  ;;  %2801 = vmatpush1.bf16.msra.mxu1 %v3476_v30 }
 0x54b   :  { %2771 = vmatprep.subr.bf16.mxu0 %v3523_v45  ;;  %2803 = vmatprep.subr.bf16.mxu1 %v3525_v53 }
 0x54e   :  { %2773 = vmatpush1.bf16.msra.mxu0 %v3527_v55  ;;  %2805 = vmatpush1.bf16.msra.mxu1 %v3530_v62 }
 0x54f   :  { %2775 = vmatprep.subr.bf16.mxu0 %v3535_v22  ;;  %2807 = vmatprep.subr.bf16.mxu1 %v3537_v38 }
 0x552   :  { %2777 = vmatpush1.bf16.msra.mxu0 %v3539_v18  ;;  %2809 = vmatpush1.bf16.msra.mxu1 %v3542_v21 }
 0x553   :  { %2779 = vmatprep.subr.bf16.mxu0 %v3547_v50  ;;  %2811 = vmatprep.subr.bf16.mxu1 %v3549_v2 }
 0x556   :  { %2781 = vmatpush1.bf16.msra.mxu0 %v3551_v5  ;;  %2813 = vmatpush1.bf16.msra.mxu1 %v3554_v15 }
 0x557   :  { %2783 = vmatprep.subr.bf16.mxu0 %v3558_v33  ;;  %2815 = vmatprep.subr.bf16.mxu1 %v3561_v52 }
 0x55a   :  { %2785 = vmatpush1.bf16.msra.mxu0 %v3563_v56  ;;  %2817 = vmatpush1.bf16.msra.mxu1 %v3566_v31 }
 0x55b   :  { %2787 = vmatprep.subr.bf16.mxu0 %v3569_v44  ;;  %2819 = vmatprep.subr.bf16.mxu1 %v3571_v48 }
 0x55e   :  { %2789 = vmatpush1.bf16.msra.mxu0 %v3574_v59  ;;  %2821 = vmatpush1.bf16.msra.mxu1 %v3578_v25 }
 0x55f   :  { %2791 = vmatprep.subr.bf16.mxu0 %v3580_v34  ;;  %2823 = vmatprep.subr.bf16.mxu1 %v3583_v27 }
 0x562   :  { %2793 = vmatpush1.bf16.msra.mxu0 %v3586_v58  ;;  %2825 = vmatpush1.bf16.msra.mxu1 %v3590_v61 }
 0x563   :  { %2827 = vmatprep.subr.bf16.mxu0 %v2826_v3  ;;  %2859 = vmatprep.subr.bf16.mxu1 %v2858_v20 }
 0x618   :  { %v1712_v12 = vpop.f32.mrb[10].mxu0  ;;  %v1783_v29 = vpop.f32.mrb[10].mxu1 }
 0x619   :  { %v2900_v13 = vadd.f32 %v1712_v12, %v3400_v14  ;;  %v1714_v26 = vpop.f32.mrb[11].mxu0  ;;  %v1785_v17 = vpop.f32.mrb[11].mxu1  ;;  %v2916_v8 = vadd.f32 %v1783_v29, %v3409_v40  ;;  %v2070_v12 = vld [vmem:[#allocation5 + $0x10] sm:$0xff] }
 0x61a   :  { %v2901_v30 = vadd.f32 %v1714_v26, %v3402_v16  ;;  %v2917_v54 = vadd.f32 %v1785_v17, %v3406_v32  ;;  %v2074_v29 = vld [vmem:[#allocation5 + $0x30] sm:$0xff]  ;;  %v2077_v26 = vld [vmem:[#allocation5 + $0x48] sm:$0xff] }
 0x61b   :  { %v2361_v23 = vmul.f32 -1.442695, %v2900_v13  ;;  %v2860_v13 = vpack.c.bf16 %v2074_v29, %v2070_v12  ;;  %v2081_v17 = vld [vmem:[#allocation5 + $0x68] sm:$0xff] }
 0x61c   :  { %v2362_v47 = vmul.f32 -1.442695, %v2901_v30  ;;  %v2363_v4 = vmul.f32 -1.442695, %v2917_v54  ;;  %v2079_v30 = vld [vmem:[#allocation5 + $0x58] sm:$0xff]  ;;  %v2080_v54 = vld [vmem:[#allocation5 + $0x60] sm:$0xff] }
 0x61d   :  { %3041 = vpow2.f32 %v2361_v23  ;;  %v2083_v23 = vld [vmem:[#allocation5 + $0x78] sm:$0xff] }
 0x61e   :  { %3043 = vpow2.f32 %v2362_v47  ;;  %v2076_v47 = vld [vmem:[#allocation5 + $0x40] sm:$0xff] }
 0x61f   :  { %3045 = vpow2.f32 %v2363_v4  ;;  %v2862_v4 = vpack.c.bf16 %v2083_v23, %v2079_v30 }
 0x620   :  { %3047 = vtanh.f32 %v2916_v8  ;;  %v2832_v8 = vpack.c.bf16 %v2080_v54, %v2076_v47 }
 0x627   :  { %v3042_v11 = vpop.eup %3041 }
 0x628   :  { %v3044_v19 = vpop.eup %3043  ;;  %v1795_v24 = vadd.f32 1.0, %v3042_v11  ;;  %v2078_v11 = vld [vmem:[#allocation5 + $0x50] sm:$0xff] }
 0x629   :  { %v1801_v28 = vadd.f32 1.0, %v3044_v19  ;;  %v3046_v39 = vpop.eup %3045  ;;  %v2082_v19 = vld [vmem:[#allocation5 + $0x70] sm:$0xff] }
 0x62a   :  { %3049 = vrcp.f32 %v1795_v24  ;;  %v3048_v43 = vpop.eup %3047  ;;  %v1808_v63 = vadd.f32 1.0, %v3046_v39  ;;  %v2864_v24 = vpack.c.bf16 %v2082_v19, %v2078_v11 }
 0x62b   :  { %3051 = vrcp.f32 %v1801_v28 }
 0x62c   :  { %3053 = vrcp.f32 %v1808_v63 }
 0x634   :  { %v3050_v46 = vpop.eup %3049 }
 0x635   :  { %v3052_v60 = vpop.eup %3051  ;;  %v1812_v1 = vmul.f32 %v3050_v46, %v3048_v43 }
 0x636   :  { %v1811_v6 = vmul.f32 %v3052_v60, %v3644_v9  ;;  %v3054_v36 = vpop.eup %3053  ;;  %v2068_v9 = vld [vmem:[#allocation5] sm:$0xff] }
 0x637   :  { %v2828_v42 = vpack.c.bf16 %v2072_v35, %v2068_v9 }
 0x638   :  { %v3684_v10 = vadd.f32 %v1812_v1, %v1811_v6 }
 0x63a   :  { %3055 = vtanh.f32 %v3684_v10 }
 0x644   :  { %v3056_v37 = vpop.eup %3055 }
 0x645   :  { %v1815_v41 = vmul.f32 %v3056_v37, %v3054_v36 }
 0x647   :  { %1817 = vst [vmem:[#allocation8 + $0x28] sm:$0xff] %v1815_v41  ;;  %1954 = vmatmul.mubr.f32.vlgmr.msra.gmra.mrb[12].mxu0 %v1815_v41  ;;  %2025 = vmatmul.mubr.f32.vlgmr.msra.gmra.mrb[12].mxu1 %v1815_v41 }
 0x648   :  { %2196 = vmatprep.mubr.f32.mxu0 %v3140_v0  ;;  %2267 = vmatprep.mubr.f32.mxu1 %v3140_v0  ;;  %v2830_v0 = vpack.c.bf16 %v2081_v17, %v2077_v26 }
 0x649   :  { %2829 = vmatpush1.bf16.msra.mxu0 %v2828_v42  ;;  %2861 = vmatpush1.bf16.msra.mxu1 %v2860_v13 }
 0x64a   :  { %2831 = vmatprep.subr.bf16.mxu0 %v2830_v0  ;;  %2863 = vmatprep.subr.bf16.mxu1 %v2862_v4 }
 0x64d   :  { %2833 = vmatpush1.bf16.msra.mxu0 %v2832_v8  ;;  %2865 = vmatpush1.bf16.msra.mxu1 %v2864_v24 }
 0x64e   :  { %2835 = vmatprep.subr.bf16.mxu0 %v3523_v45  ;;  %2867 = vmatprep.subr.bf16.mxu1 %v3525_v53 }
 0x651   :  { %2837 = vmatpush1.bf16.msra.mxu0 %v3527_v55  ;;  %2869 = vmatpush1.bf16.msra.mxu1 %v3530_v62 }
 0x652   :  { %2839 = vmatprep.subr.bf16.mxu0 %v3535_v22  ;;  %2871 = vmatprep.subr.bf16.mxu1 %v3537_v38 }
 0x655   :  { %2841 = vmatpush1.bf16.msra.mxu0 %v3539_v18  ;;  %2873 = vmatpush1.bf16.msra.mxu1 %v3542_v21 }
 0x656   :  { %2843 = vmatprep.subr.bf16.mxu0 %v3547_v50  ;;  %2875 = vmatprep.subr.bf16.mxu1 %v3549_v2 }
 0x659   :  { %2845 = vmatpush1.bf16.msra.mxu0 %v3551_v5  ;;  %2877 = vmatpush1.bf16.msra.mxu1 %v3554_v15 }
 0x65a   :  { %2847 = vmatprep.subr.bf16.mxu0 %v3558_v33  ;;  %2879 = vmatprep.subr.bf16.mxu1 %v3561_v52 }
 0x65d   :  { %2849 = vmatpush1.bf16.msra.mxu0 %v3563_v56  ;;  %2881 = vmatpush1.bf16.msra.mxu1 %v3566_v31 }
 0x65e   :  { %2851 = vmatprep.subr.bf16.mxu0 %v3569_v44  ;;  %2883 = vmatprep.subr.bf16.mxu1 %v3571_v48 }
 0x661   :  { %2853 = vmatpush1.bf16.msra.mxu0 %v3574_v59  ;;  %2885 = vmatpush1.bf16.msra.mxu1 %v3578_v25 }
 0x662   :  { %2855 = vmatprep.subr.bf16.mxu0 %v3580_v34  ;;  %2887 = vmatprep.subr.bf16.mxu1 %v3583_v27 }
 0x665   :  { %2857 = vmatpush1.bf16.msra.mxu0 %v3586_v58  ;;  %2889 = vmatpush1.bf16.msra.mxu1 %v3590_v61 }
 0x71a   :  { %v1955_v45 = vpop.f32.mrb[12].mxu0  ;;  %v2026_v53 = vpop.f32.mrb[12].mxu1 }
 0x71b   :  { %v2902_v55 = vadd.f32 %v1955_v45, %v3400_v14  ;;  %v1957_v62 = vpop.f32.mrb[13].mxu0  ;;  %v2028_v22 = vpop.f32.mrb[13].mxu1  ;;  %v2918_v5 = vadd.f32 %v2026_v53, %v3409_v40 }
 0x71c   :  { %v2903_v38 = vadd.f32 %v1957_v62, %v3402_v16  ;;  %v2919_v50 = vadd.f32 %v2028_v22, %v3406_v32 }
 0x71d   :  { %v2364_v18 = vmul.f32 -1.442695, %v2902_v55 }
 0x71e   :  { %v2365_v21 = vmul.f32 -1.442695, %v2903_v38  ;;  %v2366_v2 = vmul.f32 -1.442695, %v2919_v50 }
 0x71f   :  { %3057 = vpow2.f32 %v2364_v18 }
 0x720   :  { %3059 = vpow2.f32 %v2365_v21 }
 0x721   :  { %3061 = vpow2.f32 %v2366_v2 }
 0x722   :  { %3063 = vtanh.f32 %v2918_v5 }
 0x729   :  { %v3058_v15 = vpop.eup %3057 }
 0x72a   :  { %v3060_v33 = vpop.eup %3059  ;;  %v2038_v52 = vadd.f32 1.0, %v3058_v15 }
 0x72b   :  { %v2044_v56 = vadd.f32 1.0, %v3060_v33  ;;  %v3062_v31 = vpop.eup %3061 }
 0x72c   :  { %3065 = vrcp.f32 %v2038_v52  ;;  %v3064_v44 = vpop.eup %3063  ;;  %v2051_v34 = vadd.f32 1.0, %v3062_v31 }
 0x72d   :  { %3067 = vrcp.f32 %v2044_v56 }
 0x72e   :  { %3069 = vrcp.f32 %v2051_v34 }
 0x736   :  { %v3066_v48 = vpop.eup %3065 }
 0x737   :  { %v3068_v59 = vpop.eup %3067  ;;  %v2055_v25 = vmul.f32 %v3066_v48, %v3064_v44 }
 0x738   :  { %v2054_v27 = vmul.f32 %v3068_v59, %v3684_v10  ;;  %v3070_v61 = vpop.eup %3069 }
 0x73a   :  { %v2056_v58 = vadd.f32 %v2055_v25, %v2054_v27 }
 0x73c   :  { %3071 = vtanh.f32 %v2056_v58 }
 0x746   :  { %v3072_v28 = vpop.eup %3071 }
 0x747   :  { %v2058_v39 = vmul.f32 %v3072_v28, %v3070_v61 }
 0x749   :  { %2060 = vst [vmem:[#allocation8 + $0x30] sm:$0xff] %v2058_v39  ;;  %2197 = vmatmul.mubr.f32.vlgmr.msra.gmra.mrb[14].mxu0 %v2058_v39  ;;  %2268 = vmatmul.mubr.f32.vlgmr.msra.gmra.mrb[14].mxu1 %v2058_v39 }
 0x81c   :  { %v2198_v43 = vpop.f32.mrb[14].mxu0  ;;  %v2269_v46 = vpop.f32.mrb[14].mxu1 }
 0x81d   :  { %v2904_v60 = vadd.f32 %v2198_v43, %v3400_v14  ;;  %v2200_v1 = vpop.f32.mrb[15].mxu0  ;;  %v2271_v63 = vpop.f32.mrb[15].mxu1  ;;  %v2920_v49 = vadd.f32 %v2269_v46, %v3409_v40 }
 0x81e   :  { %v2905_v6 = vadd.f32 %v2200_v1, %v3402_v16  ;;  %v2921_v10 = vadd.f32 %v2271_v63, %v3406_v32 }
 0x81f   :  { %v2367_v36 = vmul.f32 -1.442695, %v2904_v60 }
 0x820   :  { %v2368_v37 = vmul.f32 -1.442695, %v2905_v6  ;;  %v2369_v41 = vmul.f32 -1.442695, %v2921_v10 }
 0x821   :  { %3073 = vpow2.f32 %v2367_v36 }
 0x822   :  { %3075 = vpow2.f32 %v2368_v37 }
 0x823   :  { %3077 = vpow2.f32 %v2369_v41 }
 0x824   :  { %3079 = vtanh.f32 %v2920_v49 }
 0x82b   :  { %v3074_v51 = vpop.eup %3073 }
 0x82c   :  { %v3076_v57 = vpop.eup %3075  ;;  %v2281_v3 = vadd.f32 1.0, %v3074_v51 }
 0x82d   :  { %v2287_v7 = vadd.f32 1.0, %v3076_v57  ;;  %v3078_v14 = vpop.eup %3077 }
 0x82e   :  { %3081 = vrcp.f32 %v2281_v3  ;;  %v3080_v9 = vpop.eup %3079  ;;  %v2294_v42 = vadd.f32 1.0, %v3078_v14 }
 0x82f   :  { %3083 = vrcp.f32 %v2287_v7 }
 0x830   :  { %3085 = vrcp.f32 %v2294_v42 }
 0x838   :  { %v3082_v16 = vpop.eup %3081 }
 0x839   :  { %v3084_v35 = vpop.eup %3083  ;;  %v2298_v20 = vmul.f32 %v3082_v16, %v3080_v9 }
 0x83a   :  { %v2297_v12 = vmul.f32 %v3084_v35, %v2056_v58  ;;  %v3086_v32 = vpop.eup %3085 }
 0x83c   :  { %v2299_v29 = vadd.f32 %v2298_v20, %v2297_v12 }
 0x83e   :  { %3087 = vtanh.f32 %v2299_v29 }
 0x848   :  { %v3088_v40 = vpop.eup %3087 }
 0x849   :  { %v2301_v13 = vmul.f32 %v3088_v40, %v3086_v32 }
 0x84b   :  { %2303 = vst [vmem:[#allocation8 + $0x38] sm:$0xff] %v2301_v13 }
 0x84c   :  { %3122 = shalt.err (!%p3119_p12)
}
 0x84d   :  { %s3123_s11 = scalar_lea.hbm %s3738_s4, 1024 }
 0x84e   :  { %p3124_p13 = scmp.ne.s32.totalorder %s3738_s4, %s3123_s11  ;;  %p3127_p0 = scmp.lt.u32.totalorder %s3123_s11, %s3738_s4 }
 0x850   :  { %p3129_p1 = pnand %p3127_p0, %p3124_p13 }
 0x852   :  { %3132 = shalt.err (!%p3129_p1)
}
 0x853   :  { %s3142_s16 = smov 128   ;;  %s3143_s17 = smov 8  }
 0x854   :  { %2317 = dma.vmem_to_hbm [thread:$0]  %s2312_s8, 1024, %s3738_s4, [#allocation7], %s3142_s16, %s3142_s16, %s3143_s17  }
 0x855   :  { %3135 = dma.done.wait [#allocation7], 1024  }
 0x856   :  { %3136 = vsyncadd [#allocation7], 4294966272 }
 0x857   :  { %2321 = vsyncpa [#allocation6], 1 }
 0x858   :  { %2322 = vsyncpa [#allocation7], 1 }

</bundles_post_ra>
